<compile_context>
chip_gen: v7x
topology: tpu7x:2x2x1
jax: 0.10.0
libtpu: 0.0.40
codegen_flags: <defaults>
</compile_context>

<pallas_src>
import functools
import numpy as np
import jax
import jax.numpy as jnp
from jax.experimental import pallas as pl
from jax.experimental.pallas import tpu as pltpu

# ----------------------------------------------------------------------------
# Config (mirrors the PyTorch `config` object used by FTLSTMLayer)
# ----------------------------------------------------------------------------
HIDDEN_SIZE = 32            # config.hidden_size
LSTM_HIDDEN = HIDDEN_SIZE // 2
NUM_LABELS = 1              # classifier head; kernel epilogue assumes num_labels == 1
SEQ_LEN = 8
BATCH = 1                   # required by map_elapse_time (see note above)
INIT_RANGE = 0.02           # config.initializer_range
LN_EPS = 1e-12              # config.layer_norm_eps
DROPOUT_P = 0.0             # config.hidden_dropout_prob -> dropout is identity
EMBED_MODE = "all"          # config.embed_mode
MAX_NOTE_POS = 50
MAX_CHUNK_POS = 50

# Packed parameter slab layout (rows x 128 lanes, f32):
#   rows   0: 32, cols 0:80   -> W_ext      = [W_cat(32x64) | 0(32x16)]
#   rows  32: 64, cols 0:80   -> HC_W       = [[U_cat, 0], [0, W_decomp]]   (block diagonal)
#   rows  64: 96, cols 0:32   -> Wa         (inputs part of combine Linear)
#   row   96    , cols 0:32 comb_b ; 32:64 ln_gamma ; 64:96 ln_beta
#   row   97    , cols 0:80   -> b_ext      = [b_gates(64) | b_decomp(16)]
#   rows  98:100, cols 0:16   -> cls_w2     (classifier weight reshaped (2,16))
#   row  100    , col  0      -> cls_b
#   rows 104:154, cols 0:32 note_proj(50x32) ; cols 32:64 chunk_proj(50x32)
TAB_BASE = 104
SLAB_ROWS = 160


# ----------------------------------------------------------------------------
# Fused Pallas kernel: gather+combine (Linear+LN) -> bidirectional FT-LSTM -> classifier
# ----------------------------------------------------------------------------
def _ftlstm_fused_kernel(slab_ref, x_ref, t_ref, decay_ref, nids_ref, cids_ref,
                         hid_out_ref, pred_ref, *, seq_len, h_hid, eps, tab_base):
    S = seq_len
    hh = h_hid
    f32 = jnp.float32

    # ---- static slices of the packed parameter slab ----
    w_ext = slab_ref[0:32, 0:80]          # x -> [gate pre-acts | 0]
    hc_w = slab_ref[32:64, 0:80]          # [h | c] -> [h@U_cat | c@W_decomp]
    wa = slab_ref[64:96, 0:32]            # combine Linear, inputs part
    comb_b = slab_ref[96:97, 0:32]
    ln_g = slab_ref[96:97, 32:64]
    ln_b = slab_ref[96:97, 64:96]
    b_ext = slab_ref[97:98, 0:80]         # [b_gates | b_decomp]
    cls_w = slab_ref[98:100, 0:16]        # (2, hh)
    cls_b = slab_ref[100:101, 0:1]        # (1, 1)

    # ---- PatientLevelEmbedding combine: x@Wa + gathered pre-projected note/chunk rows ----
    x = x_ref[0]                                                   # (S, H)
    y = jnp.dot(x, wa, preferred_element_type=f32) + comb_b        # (S, H)
    note_rows = [slab_ref[pl.ds(tab_base + nids_ref[s], 1), 0:32] for s in range(S)]
    chunk_rows = [slab_ref[pl.ds(tab_base + cids_ref[s], 1), 32:64] for s in range(S)]
    y = y + jnp.concatenate(note_rows, axis=0) + jnp.concatenate(chunk_rows, axis=0)

    # LayerNorm (dropout p=0 -> identity)
    mean = jnp.mean(y, axis=-1, keepdims=True)
    var = jnp.mean(jnp.square(y - mean), axis=-1, keepdims=True)
    ni = (y - mean) * jax.lax.rsqrt(var + eps) * ln_g + ln_b       # (S, H)

    # ---- interleave fwd/bwd rows ONCE (row 2s = fwd step s, row 2s+1 = bwd step s) ----
    pairs = []
    for s in range(S):
        pairs.append(ni[s:s + 1, :])                 # forward step s
        pairs.append(ni[S - 1 - s:S - s, :])         # backward step s (flipped input)
    ni2 = jnp.concatenate(pairs, axis=0)             # (2S, H)

    # Input-dependent pre-activations for all steps/directions, off the serial chain.
    # Columns: [i | f | o | C] gate pre-acts (64) then b_decomp slot (16).
    xg = jnp.dot(ni2, w_ext, preferred_element_type=f32) + b_ext   # (2S, 5*hh)

    # ---- elapse-time decay T (vectorized map_elapse_time; only needs T - 1) ----
    t = t_ref[...]                                                 # (1, S), t > 0
    a, bexp, m = decay_ref[0], decay_ref[1], decay_ref[2]
    k, d, n = decay_ref[3], decay_ref[4], decay_ref[5]
    w1, w2, w3 = decay_ref[6], decay_ref[7], decay_ref[8]
    T1 = 1.0 / (a * jnp.exp(bexp * jnp.log(t)))                    # 1 / (a * t^b)
    T2 = k - m * t
    T3 = 1.0 / (1.0 + jnp.exp(n * jnp.log(t / d)))                 # 1 / (1 + (t/d)^n)
    T = jnp.minimum(jnp.maximum(w1 * T1 + w2 * T2 + w3 * T3, 0.0), 1.0)
    Tm1 = T - 1.0                                                  # c_adj = c + (T-1)*C_ST

    # ---- bidirectional recurrence: row 0 = forward, row 1 = backward ----
    h = jnp.zeros((2, hh), f32)
    c = jnp.zeros((2, hh), f32)
    h_rows = []
    for s in range(S):                               # fully unrolled, static indices only
        xg_s = xg[2 * s:2 * s + 2, :]                # (2, 5*hh) static contiguous slice
        bidx = 0 if s == 0 else S - s                # PyTorch: bwd step 0 reuses times[0]
        tm1_s = jnp.concatenate([Tm1[0:1, s:s + 1],
                                 Tm1[0:1, bidx:bidx + 1]], axis=0)   # (2, 1)

        # ONE fused matmul on the serial chain: [h | c] @ block-diag([U_cat, W_decomp])
        hc = jnp.concatenate([h, c], axis=1)                         # (2, 2*hh)
        pre = xg_s + jnp.dot(hc, hc_w, preferred_element_type=f32)   # (2, 5*hh)

        C_ST = jnp.tanh(pre[:, 4 * hh:5 * hh])
        g = jax.nn.sigmoid(pre[:, 0:4 * hh])         # candidate C uses sigmoid (as in torch)
        i_g = g[:, 0:hh]
        f_g = g[:, hh:2 * hh]
        o_g = g[:, 2 * hh:3 * hh]
        cand = g[:, 3 * hh:4 * hh]

        c = f_g * (c + tm1_s * C_ST) + i_g * cand
        h = o_g * jnp.tanh(c)
        h_rows.append(jnp.concatenate([h[0:1, :], h[1:2, :]], axis=1))  # (1, 2*hh) [fwd|bwd]

    # single consolidated, lane-dense store of the hidden history
    hid_out_ref[...] = jnp.concatenate(h_rows, axis=0)              # (S, 2*hh)

    # ---- classifier on the final hidden state of both directions (num_labels == 1) ----
    logit = jnp.sum(h * cls_w, keepdims=True) + cls_b               # (1, 1)
    logit = jnp.where(jnp.isnan(logit) | jnp.isinf(logit), jnp.zeros_like(logit), logit)
    pred_ref[...] = jax.nn.sigmoid(logit)            # post-sigmoid scrub is redundant


# ----------------------------------------------------------------------------
# Parameter init (deterministic; mirrors module __init__ + SelfDefineBert.init_weights)
# ----------------------------------------------------------------------------
def init_params(key):
    ks = jax.random.split(key, 16)

    def nrm(k, shape):
        return (INIT_RANGE * jax.random.normal(k, shape)).astype(jnp.float32)

    p = {}
    # FTLSTM gate weights, stacked in gate order [i, f, og, C]
    p["W"] = jnp.stack([nrm(ks[j], (HIDDEN_SIZE, LSTM_HIDDEN)) for j in range(4)])
    p["U"] = jnp.stack([nrm(ks[4 + j], (LSTM_HIDDEN, LSTM_HIDDEN)) for j in range(4)])
    p["b"] = jnp.zeros((4, 1, LSTM_HIDDEN), jnp.float32)
    p["W_decomp"] = nrm(ks[8], (LSTM_HIDDEN, LSTM_HIDDEN))
    p["b_decomp"] = jnp.zeros((1, LSTM_HIDDEN), jnp.float32)
    # decay params: a, b, m, k, d, n, W_decay_1, W_decay_2, W_decay_3
    p["decay"] = jnp.array([1.0, 1.0, 0.02, 2.9, 4.5, 2.5, 0.33, 0.33, 0.33], jnp.float32)
    # PatientLevelEmbedding (embed_mode='all')
    p["note_emb"] = nrm(ks[9], (MAX_NOTE_POS, HIDDEN_SIZE))
    p["chunk_emb"] = nrm(ks[10], (MAX_CHUNK_POS, HIDDEN_SIZE))
    p["comb_w"] = nrm(ks[11], (3 * HIDDEN_SIZE, HIDDEN_SIZE))   # stored (in, out) for x @ W
    p["comb_b"] = jnp.zeros((1, HIDDEN_SIZE), jnp.float32)
    p["ln_g"] = jnp.ones((1, HIDDEN_SIZE), jnp.float32)
    p["ln_b"] = jnp.zeros((1, HIDDEN_SIZE), jnp.float32)
    # classifier Linear(H -> num_labels), stored (in, out)
    p["cls_w"] = nrm(ks[12], (HIDDEN_SIZE, NUM_LABELS))
    p["cls_b"] = jnp.zeros((NUM_LABELS,), jnp.float32)
    return p


# ----------------------------------------------------------------------------
# One-time parameter preparation: fuse/stack all weights into a single VMEM slab.
# ----------------------------------------------------------------------------
def prepare_params(p):
    H, hh = HIDDEN_SIZE, LSTM_HIDDEN
    W, U, b = p["W"], p["U"], p["b"]
    w_cat = jnp.concatenate([W[0], W[1], W[2], W[3]], axis=1)     # (H, 4*hh)
    u_cat = jnp.concatenate([U[0], U[1], U[2], U[3]], axis=1)     # (hh, 4*hh)
    bg = jnp.concatenate([b[0], b[1], b[2], b[3]], axis=1)        # (1, 4*hh)

    comb_w = p["comb_w"]                                          # (3H, H)
    Wa, Wb, Wc = comb_w[0:H], comb_w[H:2 * H], comb_w[2 * H:3 * H]
    # Linear is linear: pre-project the embedding tables through their combine blocks.
    note_proj = p["note_emb"] @ Wb                                # (MAX_NOTE_POS, H)
    chunk_proj = p["chunk_emb"] @ Wc                              # (MAX_CHUNK_POS, H)

    slab = jnp.zeros((SLAB_ROWS, 128), jnp.float32)
    slab = slab.at[0:32, 0:64].set(w_cat)                         # W_ext = [W_cat | 0]
    slab = slab.at[32:48, 0:64].set(u_cat)                        # HC_W block-diag
    slab = slab.at[48:64, 64:80].set(p["W_decomp"])
    slab = slab.at[64:96, 0:32].set(Wa)
    slab = slab.at[96, 0:32].set(p["comb_b"][0])
    slab = slab.at[96, 32:64].set(p["ln_g"][0])
    slab = slab.at[96, 64:96].set(p["ln_b"][0])
    slab = slab.at[97, 0:64].set(bg[0])                           # b_ext = [bg | b_decomp]
    slab = slab.at[97, 64:80].set(p["b_decomp"][0])
    slab = slab.at[98:100, 0:16].set(p["cls_w"].reshape(2, LSTM_HIDDEN))
    slab = slab.at[100, 0].set(p["cls_b"][0])
    slab = slab.at[TAB_BASE:TAB_BASE + MAX_NOTE_POS, 0:32].set(note_proj)
    slab = slab.at[TAB_BASE:TAB_BASE + MAX_CHUNK_POS, 32:64].set(chunk_proj)
    return {"slab": slab, "decay": p["decay"]}


# ----------------------------------------------------------------------------
# FTLSTMLayer.forward (inference path, labels=None)
# ----------------------------------------------------------------------------
@jax.jit
def ftlstm_layer_forward(prep, inputs, times, new_note_ids, new_chunk_ids):
    # inputs: (1, S, H) f32, times: (1, S) f32, ids: (1, S) int32  — B must be 1.
    S = inputs.shape[1]
    vmem = pl.BlockSpec(memory_space=pltpu.MemorySpace.VMEM)
    smem = pl.BlockSpec(memory_space=pltpu.MemorySpace.SMEM)

    hid, pred = pl.pallas_call(
        functools.partial(_ftlstm_fused_kernel, seq_len=S, h_hid=LSTM_HIDDEN,
                          eps=LN_EPS, tab_base=TAB_BASE),
        out_shape=(jax.ShapeDtypeStruct((S, 2 * LSTM_HIDDEN), jnp.float32),
                   jax.ShapeDtypeStruct((1, 1), jnp.float32)),
        in_specs=[vmem, vmem, vmem, smem, smem, smem],
        out_specs=(vmem, vmem),
    )(prep["slab"], inputs, times, prep["decay"],
      new_note_ids.reshape(-1), new_chunk_ids.reshape(-1))

    # (S, 2*hh) with row s = [fwd_s | bwd_s] -> (1, S, H); backward NOT re-flipped,
    # exactly as torch.cat((hidden_his, second_hidden_his), dim=2) in FTLSTM.forward.
    lstm_output = hid.reshape(1, S, 2 * LSTM_HIDDEN)
    pred = pred.reshape(NUM_LABELS)
    # TODO(synk): training branch (BCEWithLogitsLoss) not exercised here since labels=None.
    return pred, lstm_output


# ----------------------------------------------------------------------------
# Pure-JAX reference (mirrors the PyTorch forward) for a correctness check.
# ----------------------------------------------------------------------------
def _ref_forward(params, inputs, times, new_note_ids, new_chunk_ids):
    note_e = params["note_emb"][new_note_ids]
    chunk_e = params["chunk_emb"][new_chunk_ids]
    cat = jnp.concatenate([inputs, note_e, chunk_e], axis=2)[0]
    y = cat @ params["comb_w"] + params["comb_b"]
    mean = jnp.mean(y, -1, keepdims=True)
    var = jnp.mean((y - mean) ** 2, -1, keepdims=True)
    new_input = (y - mean) / jnp.sqrt(var + LN_EPS) * params["ln_g"] + params["ln_b"]

    a, bexp, m, k, d, n, w1, w2, w3 = [params["decay"][i] for i in range(9)]

    def run_dir(xs, ts):
        h = jnp.zeros((1, LSTM_HIDDEN), jnp.float32)
        c = jnp.zeros((1, LSTM_HIDDEN), jnp.float32)
        hs = []
        for s in range(xs.shape[0]):
            t = ts[s]
            T = (w1 * (1.0 / (a * t ** bexp)) + w2 * (k - m * t)
                 + w3 * (1.0 / (1.0 + (t / d) ** n)))
            T = jnp.clip(T, 0.0, 1.0)
            C_ST = jnp.tanh(c @ params["W_decomp"] + params["b_decomp"])
            c_adj = c - C_ST + T * C_ST
            x = xs[s]
            g = [jax.nn.sigmoid(x @ params["W"][j] + h @ params["U"][j] + params["b"][j])
                 for j in range(4)]
            c = g[1] * c_adj + g[0] * g[3]
            h = g[2] * jnp.tanh(c)
            hs.append(h)
        return jnp.stack(hs)

    x_fwd = new_input[:, None, :]
    t_fwd = times[0]
    hid_f = run_dir(x_fwd, t_fwd)
    t_rev = jnp.flip(t_fwd)
    hid_b = run_dir(jnp.flip(x_fwd, 0), jnp.concatenate([t_fwd[:1], t_rev[:-1]]))
    lstm_output = jnp.transpose(jnp.concatenate([hid_f, hid_b], 2), (1, 0, 2))
    drop_input = lstm_output[0, -1, :]
    logits = drop_input @ params["cls_w"] + params["cls_b"]
    return jax.nn.sigmoid(logits), lstm_output


if __name__ == "__main__":
    key = jax.random.PRNGKey(0)
    kp, kx, kt, kn, kc = jax.random.split(key, 5)
    params = init_params(kp)
    prep = prepare_params(params)   # one-time weight fusion / slab packing

    inputs = jax.random.normal(kx, (BATCH, SEQ_LEN, HIDDEN_SIZE), jnp.float32)
    times = jax.random.uniform(kt, (BATCH, SEQ_LEN), jnp.float32) * 10.0 + 0.5  # positive
    new_note_ids = jax.random.randint(kn, (BATCH, SEQ_LEN), 0, MAX_NOTE_POS)
    new_chunk_ids = jax.random.randint(kc, (BATCH, SEQ_LEN), 0, MAX_CHUNK_POS)

    pred, lstm_out = ftlstm_layer_forward(prep, inputs, times, new_note_ids, new_chunk_ids)
    pred = jax.block_until_ready(pred)
    lstm_out = jax.block_until_ready(lstm_out)

    ref_pred, ref_lstm = _ref_forward(params, inputs, times, new_note_ids, new_chunk_ids)
    np.testing.assert_allclose(np.asarray(lstm_out), np.asarray(ref_lstm), rtol=5e-2, atol=5e-3)
    np.testing.assert_allclose(np.asarray(pred), np.asarray(ref_pred), rtol=5e-2, atol=5e-3)

    print("KERNEL_OK")
</pallas_src>

<mosaic_0001>
module attributes {stable_mosaic.version = 11 : i64} {
  func.func @_ftlstm_fused_kernel(%arg0: memref<160x128xf32, #tpu.memory_space<vmem>>, %arg1: memref<1x8x32xf32, #tpu.memory_space<vmem>>, %arg2: memref<1x8xf32, #tpu.memory_space<vmem>>, %arg3: memref<9xf32, #tpu.memory_space<smem>>, %arg4: memref<8xi32, #tpu.memory_space<smem>>, %arg5: memref<8xi32, #tpu.memory_space<smem>>, %arg6: memref<8x32xf32, #tpu.memory_space<vmem>>, %arg7: memref<1x1xf32, #tpu.memory_space<vmem>>) attributes {dimension_semantics = [], scalar_prefetch = 0 : i64, scratch_operands = 0 : i64, tpu.core_type = #tpu.core_type<tc>} {
    %c0 = arith.constant 0 : index
    %c0_0 = arith.constant 0 : index
    %0 = vector.load %arg0[%c0, %c0_0] : memref<160x128xf32, #tpu.memory_space<vmem>>, vector<32x80xf32>
    %c32 = arith.constant 32 : index
    %c0_1 = arith.constant 0 : index
    %1 = vector.load %arg0[%c32, %c0_1] : memref<160x128xf32, #tpu.memory_space<vmem>>, vector<32x80xf32>
    %c64 = arith.constant 64 : index
    %c0_2 = arith.constant 0 : index
    %2 = vector.load %arg0[%c64, %c0_2] : memref<160x128xf32, #tpu.memory_space<vmem>>, vector<32x32xf32>
    %c96 = arith.constant 96 : index
    %c0_3 = arith.constant 0 : index
    %3 = vector.load %arg0[%c96, %c0_3] : memref<160x128xf32, #tpu.memory_space<vmem>>, vector<1x32xf32>
    %c96_4 = arith.constant 96 : index
    %c32_5 = arith.constant 32 : index
    %4 = vector.load %arg0[%c96_4, %c32_5] : memref<160x128xf32, #tpu.memory_space<vmem>>, vector<1x32xf32>
    %c96_6 = arith.constant 96 : index
    %c64_7 = arith.constant 64 : index
    %5 = vector.load %arg0[%c96_6, %c64_7] : memref<160x128xf32, #tpu.memory_space<vmem>>, vector<1x32xf32>
    %c97 = arith.constant 97 : index
    %c0_8 = arith.constant 0 : index
    %6 = vector.load %arg0[%c97, %c0_8] : memref<160x128xf32, #tpu.memory_space<vmem>>, vector<1x80xf32>
    %c98 = arith.constant 98 : index
    %c0_9 = arith.constant 0 : index
    %7 = vector.load %arg0[%c98, %c0_9] : memref<160x128xf32, #tpu.memory_space<vmem>>, vector<2x16xf32>
    %c100 = arith.constant 100 : index
    %c0_10 = arith.constant 0 : index
    %8 = vector.load %arg0[%c100, %c0_10] : memref<160x128xf32, #tpu.memory_space<vmem>>, vector<1x1xf32>
    %c0_11 = arith.constant 0 : index
    %c0_12 = arith.constant 0 : index
    %c0_13 = arith.constant 0 : index
    %9 = vector.load %arg1[%c0_11, %c0_12, %c0_13] : memref<1x8x32xf32, #tpu.memory_space<vmem>>, vector<1x8x32xf32>
    %10 = vector.shape_cast %9 : vector<1x8x32xf32> to vector<8x32xf32>
    %cst = arith.constant dense<0.000000e+00> : vector<8x32xf32>
    %11 = tpu.matmul %10, %2, %cst {dimension_numbers = #tpu.dot_dimension_numbers<[1], [0], [0], [1], [0, 0, 1, 1], [], []>} : vector<8x32xf32>, vector<32x32xf32>, vector<8x32xf32> -> vector<8x32xf32>
    %12 = vector.broadcast %3 : vector<1x32xf32> to vector<8x32xf32>
    %13 = arith.addf %11, %12 : vector<8x32xf32>
    %c0_14 = arith.constant 0 : index
    %14 = memref.load %arg4[%c0_14] : memref<8xi32, #tpu.memory_space<smem>>
    %c104_i32 = arith.constant 104 : i32
    %15 = arith.addi %c104_i32, %14 : i32
    %16 = arith.index_cast %15 : i32 to index
    %c0_15 = arith.constant 0 : index
    %17 = vector.load %arg0[%16, %c0_15] : memref<160x128xf32, #tpu.memory_space<vmem>>, vector<1x32xf32>
    %c1 = arith.constant 1 : index
    %18 = memref.load %arg4[%c1] : memref<8xi32, #tpu.memory_space<smem>>
    %c104_i32_16 = arith.constant 104 : i32
    %19 = arith.addi %c104_i32_16, %18 : i32
    %20 = arith.index_cast %19 : i32 to index
    %c0_17 = arith.constant 0 : index
    %21 = vector.load %arg0[%20, %c0_17] : memref<160x128xf32, #tpu.memory_space<vmem>>, vector<1x32xf32>
    %c2 = arith.constant 2 : index
    %22 = memref.load %arg4[%c2] : memref<8xi32, #tpu.memory_space<smem>>
    %c104_i32_18 = arith.constant 104 : i32
    %23 = arith.addi %c104_i32_18, %22 : i32
    %24 = arith.index_cast %23 : i32 to index
    %c0_19 = arith.constant 0 : index
    %25 = vector.load %arg0[%24, %c0_19] : memref<160x128xf32, #tpu.memory_space<vmem>>, vector<1x32xf32>
    %c3 = arith.constant 3 : index
    %26 = memref.load %arg4[%c3] : memref<8xi32, #tpu.memory_space<smem>>
    %c104_i32_20 = arith.constant 104 : i32
    %27 = arith.addi %c104_i32_20, %26 : i32
    %28 = arith.index_cast %27 : i32 to index
    %c0_21 = arith.constant 0 : index
    %29 = vector.load %arg0[%28, %c0_21] : memref<160x128xf32, #tpu.memory_space<vmem>>, vector<1x32xf32>
    %c4 = arith.constant 4 : index
    %30 = memref.load %arg4[%c4] : memref<8xi32, #tpu.memory_space<smem>>
    %c104_i32_22 = arith.constant 104 : i32
    %31 = arith.addi %c104_i32_22, %30 : i32
    %32 = arith.index_cast %31 : i32 to index
    %c0_23 = arith.constant 0 : index
    %33 = vector.load %arg0[%32, %c0_23] : memref<160x128xf32, #tpu.memory_space<vmem>>, vector<1x32xf32>
    %c5 = arith.constant 5 : index
    %34 = memref.load %arg4[%c5] : memref<8xi32, #tpu.memory_space<smem>>
    %c104_i32_24 = arith.constant 104 : i32
    %35 = arith.addi %c104_i32_24, %34 : i32
    %36 = arith.index_cast %35 : i32 to index
    %c0_25 = arith.constant 0 : index
    %37 = vector.load %arg0[%36, %c0_25] : memref<160x128xf32, #tpu.memory_space<vmem>>, vector<1x32xf32>
    %c6 = arith.constant 6 : index
    %38 = memref.load %arg4[%c6] : memref<8xi32, #tpu.memory_space<smem>>
    %c104_i32_26 = arith.constant 104 : i32
    %39 = arith.addi %c104_i32_26, %38 : i32
    %40 = arith.index_cast %39 : i32 to index
    %c0_27 = arith.constant 0 : index
    %41 = vector.load %arg0[%40, %c0_27] : memref<160x128xf32, #tpu.memory_space<vmem>>, vector<1x32xf32>
    %c7 = arith.constant 7 : index
    %42 = memref.load %arg4[%c7] : memref<8xi32, #tpu.memory_space<smem>>
    %c104_i32_28 = arith.constant 104 : i32
    %43 = arith.addi %c104_i32_28, %42 : i32
    %44 = arith.index_cast %43 : i32 to index
    %c0_29 = arith.constant 0 : index
    %45 = vector.load %arg0[%44, %c0_29] : memref<160x128xf32, #tpu.memory_space<vmem>>, vector<1x32xf32>
    %c0_30 = arith.constant 0 : index
    %46 = memref.load %arg5[%c0_30] : memref<8xi32, #tpu.memory_space<smem>>
    %c104_i32_31 = arith.constant 104 : i32
    %47 = arith.addi %c104_i32_31, %46 : i32
    %48 = arith.index_cast %47 : i32 to index
    %c32_32 = arith.constant 32 : index
    %49 = vector.load %arg0[%48, %c32_32] : memref<160x128xf32, #tpu.memory_space<vmem>>, vector<1x32xf32>
    %c1_33 = arith.constant 1 : index
    %50 = memref.load %arg5[%c1_33] : memref<8xi32, #tpu.memory_space<smem>>
    %c104_i32_34 = arith.constant 104 : i32
    %51 = arith.addi %c104_i32_34, %50 : i32
    %52 = arith.index_cast %51 : i32 to index
    %c32_35 = arith.constant 32 : index
    %53 = vector.load %arg0[%52, %c32_35] : memref<160x128xf32, #tpu.memory_space<vmem>>, vector<1x32xf32>
    %c2_36 = arith.constant 2 : index
    %54 = memref.load %arg5[%c2_36] : memref<8xi32, #tpu.memory_space<smem>>
    %c104_i32_37 = arith.constant 104 : i32
    %55 = arith.addi %c104_i32_37, %54 : i32
    %56 = arith.index_cast %55 : i32 to index
    %c32_38 = arith.constant 32 : index
    %57 = vector.load %arg0[%56, %c32_38] : memref<160x128xf32, #tpu.memory_space<vmem>>, vector<1x32xf32>
    %c3_39 = arith.constant 3 : index
    %58 = memref.load %arg5[%c3_39] : memref<8xi32, #tpu.memory_space<smem>>
    %c104_i32_40 = arith.constant 104 : i32
    %59 = arith.addi %c104_i32_40, %58 : i32
    %60 = arith.index_cast %59 : i32 to index
    %c32_41 = arith.constant 32 : index
    %61 = vector.load %arg0[%60, %c32_41] : memref<160x128xf32, #tpu.memory_space<vmem>>, vector<1x32xf32>
    %c4_42 = arith.constant 4 : index
    %62 = memref.load %arg5[%c4_42] : memref<8xi32, #tpu.memory_space<smem>>
    %c104_i32_43 = arith.constant 104 : i32
    %63 = arith.addi %c104_i32_43, %62 : i32
    %64 = arith.index_cast %63 : i32 to index
    %c32_44 = arith.constant 32 : index
    %65 = vector.load %arg0[%64, %c32_44] : memref<160x128xf32, #tpu.memory_space<vmem>>, vector<1x32xf32>
    %c5_45 = arith.constant 5 : index
    %66 = memref.load %arg5[%c5_45] : memref<8xi32, #tpu.memory_space<smem>>
    %c104_i32_46 = arith.constant 104 : i32
    %67 = arith.addi %c104_i32_46, %66 : i32
    %68 = arith.index_cast %67 : i32 to index
    %c32_47 = arith.constant 32 : index
    %69 = vector.load %arg0[%68, %c32_47] : memref<160x128xf32, #tpu.memory_space<vmem>>, vector<1x32xf32>
    %c6_48 = arith.constant 6 : index
    %70 = memref.load %arg5[%c6_48] : memref<8xi32, #tpu.memory_space<smem>>
    %c104_i32_49 = arith.constant 104 : i32
    %71 = arith.addi %c104_i32_49, %70 : i32
    %72 = arith.index_cast %71 : i32 to index
    %c32_50 = arith.constant 32 : index
    %73 = vector.load %arg0[%72, %c32_50] : memref<160x128xf32, #tpu.memory_space<vmem>>, vector<1x32xf32>
    %c7_51 = arith.constant 7 : index
    %74 = memref.load %arg5[%c7_51] : memref<8xi32, #tpu.memory_space<smem>>
    %c104_i32_52 = arith.constant 104 : i32
    %75 = arith.addi %c104_i32_52, %74 : i32
    %76 = arith.index_cast %75 : i32 to index
    %c32_53 = arith.constant 32 : index
    %77 = vector.load %arg0[%76, %c32_53] : memref<160x128xf32, #tpu.memory_space<vmem>>, vector<1x32xf32>
    %78 = tpu.concatenate %17, %21, %25, %29, %33, %37, %41, %45 in 0 : vector<1x32xf32>, vector<1x32xf32>, vector<1x32xf32>, vector<1x32xf32>, vector<1x32xf32>, vector<1x32xf32>, vector<1x32xf32>, vector<1x32xf32> -> vector<8x32xf32>
    %79 = arith.addf %13, %78 : vector<8x32xf32>
    %80 = tpu.concatenate %49, %53, %57, %61, %65, %69, %73, %77 in 0 : vector<1x32xf32>, vector<1x32xf32>, vector<1x32xf32>, vector<1x32xf32>, vector<1x32xf32>, vector<1x32xf32>, vector<1x32xf32>, vector<1x32xf32> -> vector<8x32xf32>
    %81 = arith.addf %79, %80 : vector<8x32xf32>
    %cst_54 = arith.constant dense<0.000000e+00> : vector<8xf32>
    %82 = vector.multi_reduction <add>, %81, %cst_54 [1] : vector<8x32xf32> to vector<8xf32>
    %83 = vector.shape_cast %82 : vector<8xf32> to vector<8x1xf32>
    %cst_55 = arith.constant 3.200000e+01 : f32
    %84 = vector.broadcast %cst_55 : f32 to vector<8x1xf32>
    %85 = arith.divf %83, %84 : vector<8x1xf32>
    %86 = vector.broadcast %85 : vector<8x1xf32> to vector<8x32xf32>
    %87 = arith.subf %81, %86 : vector<8x32xf32>
    %88 = arith.mulf %87, %87 : vector<8x32xf32>
    %cst_56 = arith.constant dense<0.000000e+00> : vector<8xf32>
    %89 = vector.multi_reduction <add>, %88, %cst_56 [1] : vector<8x32xf32> to vector<8xf32>
    %90 = vector.shape_cast %89 : vector<8xf32> to vector<8x1xf32>
    %cst_57 = arith.constant 3.200000e+01 : f32
    %91 = vector.broadcast %cst_57 : f32 to vector<8x1xf32>
    %92 = arith.divf %90, %91 : vector<8x1xf32>
    %93 = vector.broadcast %85 : vector<8x1xf32> to vector<8x32xf32>
    %94 = arith.subf %81, %93 : vector<8x32xf32>
    %cst_58 = arith.constant 9.99999996E-13 : f32
    %95 = vector.broadcast %cst_58 : f32 to vector<8x1xf32>
    %96 = arith.addf %92, %95 : vector<8x1xf32>
    %97 = math.rsqrt %96 : vector<8x1xf32>
    %98 = vector.broadcast %97 : vector<8x1xf32> to vector<8x32xf32>
    %99 = arith.mulf %94, %98 : vector<8x32xf32>
    %100 = vector.broadcast %4 : vector<1x32xf32> to vector<8x32xf32>
    %101 = arith.mulf %99, %100 : vector<8x32xf32>
    %102 = vector.broadcast %5 : vector<1x32xf32> to vector<8x32xf32>
    %103 = arith.addf %101, %102 : vector<8x32xf32>
    %104 = vector.extract_strided_slice %103 {offsets = [0, 0], sizes = [1, 32], strides = [1, 1]} : vector<8x32xf32> to vector<1x32xf32>
    %105 = vector.extract_strided_slice %103 {offsets = [7, 0], sizes = [1, 32], strides = [1, 1]} : vector<8x32xf32> to vector<1x32xf32>
    %106 = vector.extract_strided_slice %103 {offsets = [1, 0], sizes = [1, 32], strides = [1, 1]} : vector<8x32xf32> to vector<1x32xf32>
    %107 = vector.extract_strided_slice %103 {offsets = [6, 0], sizes = [1, 32], strides = [1, 1]} : vector<8x32xf32> to vector<1x32xf32>
    %108 = vector.extract_strided_slice %103 {offsets = [2, 0], sizes = [1, 32], strides = [1, 1]} : vector<8x32xf32> to vector<1x32xf32>
    %109 = vector.extract_strided_slice %103 {offsets = [5, 0], sizes = [1, 32], strides = [1, 1]} : vector<8x32xf32> to vector<1x32xf32>
    %110 = vector.extract_strided_slice %103 {offsets = [3, 0], sizes = [1, 32], strides = [1, 1]} : vector<8x32xf32> to vector<1x32xf32>
    %111 = vector.extract_strided_slice %103 {offsets = [4, 0], sizes = [1, 32], strides = [1, 1]} : vector<8x32xf32> to vector<1x32xf32>
    %112 = vector.extract_strided_slice %103 {offsets = [4, 0], sizes = [1, 32], strides = [1, 1]} : vector<8x32xf32> to vector<1x32xf32>
    %113 = vector.extract_strided_slice %103 {offsets = [3, 0], sizes = [1, 32], strides = [1, 1]} : vector<8x32xf32> to vector<1x32xf32>
    %114 = vector.extract_strided_slice %103 {offsets = [5, 0], sizes = [1, 32], strides = [1, 1]} : vector<8x32xf32> to vector<1x32xf32>
    %115 = vector.extract_strided_slice %103 {offsets = [2, 0], sizes = [1, 32], strides = [1, 1]} : vector<8x32xf32> to vector<1x32xf32>
    %116 = vector.extract_strided_slice %103 {offsets = [6, 0], sizes = [1, 32], strides = [1, 1]} : vector<8x32xf32> to vector<1x32xf32>
    %117 = vector.extract_strided_slice %103 {offsets = [1, 0], sizes = [1, 32], strides = [1, 1]} : vector<8x32xf32> to vector<1x32xf32>
    %118 = vector.extract_strided_slice %103 {offsets = [7, 0], sizes = [1, 32], strides = [1, 1]} : vector<8x32xf32> to vector<1x32xf32>
    %119 = vector.extract_strided_slice %103 {offsets = [0, 0], sizes = [1, 32], strides = [1, 1]} : vector<8x32xf32> to vector<1x32xf32>
    %120 = tpu.concatenate %104, %105, %106, %107, %108, %109, %110, %111, %112, %113, %114, %115, %116, %117, %118, %119 in 0 : vector<1x32xf32>, vector<1x32xf32>, vector<1x32xf32>, vector<1x32xf32>, vector<1x32xf32>, vector<1x32xf32>, vector<1x32xf32>, vector<1x32xf32>, vector<1x32xf32>, vector<1x32xf32>, vector<1x32xf32>, vector<1x32xf32>, vector<1x32xf32>, vector<1x32xf32>, vector<1x32xf32>, vector<1x32xf32> -> vector<16x32xf32>
    %cst_59 = arith.constant dense<0.000000e+00> : vector<16x80xf32>
    %121 = tpu.matmul %120, %0, %cst_59 {dimension_numbers = #tpu.dot_dimension_numbers<[1], [0], [0], [1], [0, 0, 1, 1], [], []>} : vector<16x32xf32>, vector<32x80xf32>, vector<16x80xf32> -> vector<16x80xf32>
    %122 = vector.broadcast %6 : vector<1x80xf32> to vector<16x80xf32>
    %123 = arith.addf %121, %122 : vector<16x80xf32>
    %c0_60 = arith.constant 0 : index
    %c0_61 = arith.constant 0 : index
    %124 = vector.load %arg2[%c0_60, %c0_61] : memref<1x8xf32, #tpu.memory_space<vmem>>, vector<1x8xf32>
    %c0_62 = arith.constant 0 : index
    %125 = memref.load %arg3[%c0_62] : memref<9xf32, #tpu.memory_space<smem>>
    %c1_63 = arith.constant 1 : index
    %126 = memref.load %arg3[%c1_63] : memref<9xf32, #tpu.memory_space<smem>>
    %c2_64 = arith.constant 2 : index
    %127 = memref.load %arg3[%c2_64] : memref<9xf32, #tpu.memory_space<smem>>
    %c3_65 = arith.constant 3 : index
    %128 = memref.load %arg3[%c3_65] : memref<9xf32, #tpu.memory_space<smem>>
    %c4_66 = arith.constant 4 : index
    %129 = memref.load %arg3[%c4_66] : memref<9xf32, #tpu.memory_space<smem>>
    %c5_67 = arith.constant 5 : index
    %130 = memref.load %arg3[%c5_67] : memref<9xf32, #tpu.memory_space<smem>>
    %c6_68 = arith.constant 6 : index
    %131 = memref.load %arg3[%c6_68] : memref<9xf32, #tpu.memory_space<smem>>
    %c7_69 = arith.constant 7 : index
    %132 = memref.load %arg3[%c7_69] : memref<9xf32, #tpu.memory_space<smem>>
    %c8 = arith.constant 8 : index
    %133 = memref.load %arg3[%c8] : memref<9xf32, #tpu.memory_space<smem>>
    %134 = math.log %124 : vector<1x8xf32>
    %135 = vector.broadcast %126 : f32 to vector<1x8xf32>
    %136 = arith.mulf %135, %134 : vector<1x8xf32>
    %137 = math.exp %136 : vector<1x8xf32>
    %138 = vector.broadcast %125 : f32 to vector<1x8xf32>
    %139 = arith.mulf %138, %137 : vector<1x8xf32>
    %cst_70 = arith.constant 1.000000e+00 : f32
    %140 = vector.broadcast %cst_70 : f32 to vector<1x8xf32>
    %141 = arith.divf %140, %139 : vector<1x8xf32>
    %142 = vector.broadcast %127 : f32 to vector<1x8xf32>
    %143 = arith.mulf %142, %124 : vector<1x8xf32>
    %144 = vector.broadcast %128 : f32 to vector<1x8xf32>
    %145 = arith.subf %144, %143 : vector<1x8xf32>
    %146 = vector.broadcast %129 : f32 to vector<1x8xf32>
    %147 = arith.divf %124, %146 : vector<1x8xf32>
    %148 = math.log %147 : vector<1x8xf32>
    %149 = vector.broadcast %130 : f32 to vector<1x8xf32>
    %150 = arith.mulf %149, %148 : vector<1x8xf32>
    %151 = math.exp %150 : vector<1x8xf32>
    %cst_71 = arith.constant 1.000000e+00 : f32
    %152 = vector.broadcast %cst_71 : f32 to vector<1x8xf32>
    %153 = arith.addf %152, %151 : vector<1x8xf32>
    %cst_72 = arith.constant 1.000000e+00 : f32
    %154 = vector.broadcast %cst_72 : f32 to vector<1x8xf32>
    %155 = arith.divf %154, %153 : vector<1x8xf32>
    %156 = vector.broadcast %131 : f32 to vector<1x8xf32>
    %157 = arith.mulf %156, %141 : vector<1x8xf32>
    %158 = vector.broadcast %132 : f32 to vector<1x8xf32>
    %159 = arith.mulf %158, %145 : vector<1x8xf32>
    %160 = arith.addf %157, %159 : vector<1x8xf32>
    %161 = vector.broadcast %133 : f32 to vector<1x8xf32>
    %162 = arith.mulf %161, %155 : vector<1x8xf32>
    %163 = arith.addf %160, %162 : vector<1x8xf32>
    %cst_73 = arith.constant 0.000000e+00 : f32
    %164 = vector.broadcast %cst_73 : f32 to vector<1x8xf32>
    %165 = arith.maximumf %163, %164 : vector<1x8xf32>
    %cst_74 = arith.constant 1.000000e+00 : f32
    %166 = vector.broadcast %cst_74 : f32 to vector<1x8xf32>
    %167 = arith.minimumf %165, %166 : vector<1x8xf32>
    %cst_75 = arith.constant 1.000000e+00 : f32
    %168 = vector.broadcast %cst_75 : f32 to vector<1x8xf32>
    %169 = arith.subf %167, %168 : vector<1x8xf32>
    %cst_76 = arith.constant 0.000000e+00 : f32
    %170 = vector.broadcast %cst_76 : f32 to vector<2x16xf32>
    %cst_77 = arith.constant 0.000000e+00 : f32
    %171 = vector.broadcast %cst_77 : f32 to vector<2x16xf32>
    %172 = vector.extract_strided_slice %123 {offsets = [0, 0], sizes = [2, 80], strides = [1, 1]} : vector<16x80xf32> to vector<2x80xf32>
    %173 = vector.extract_strided_slice %169 {offsets = [0, 0], sizes = [1, 1], strides = [1, 1]} : vector<1x8xf32> to vector<1x1xf32>
    %174 = vector.extract_strided_slice %169 {offsets = [0, 0], sizes = [1, 1], strides = [1, 1]} : vector<1x8xf32> to vector<1x1xf32>
    %175 = tpu.concatenate %173, %174 in 0 : vector<1x1xf32>, vector<1x1xf32> -> vector<2x1xf32>
    %176 = tpu.concatenate %170, %171 in 1 : vector<2x16xf32>, vector<2x16xf32> -> vector<2x32xf32>
    %cst_78 = arith.constant dense<0.000000e+00> : vector<2x80xf32>
    %177 = tpu.matmul %176, %1, %cst_78 {dimension_numbers = #tpu.dot_dimension_numbers<[1], [0], [0], [1], [0, 0, 1, 1], [], []>} : vector<2x32xf32>, vector<32x80xf32>, vector<2x80xf32> -> vector<2x80xf32>
    %178 = arith.addf %172, %177 : vector<2x80xf32>
    %179 = vector.extract_strided_slice %178 {offsets = [0, 64], sizes = [2, 16], strides = [1, 1]} : vector<2x80xf32> to vector<2x16xf32>
    %180 = math.tanh %179 : vector<2x16xf32>
    %181 = vector.extract_strided_slice %178 {offsets = [0, 0], sizes = [2, 64], strides = [1, 1]} : vector<2x80xf32> to vector<2x64xf32>
    %182 = arith.negf %181 : vector<2x64xf32>
    %183 = math.exp %182 : vector<2x64xf32>
    %cst_79 = arith.constant 1.000000e+00 : f32
    %184 = vector.broadcast %cst_79 : f32 to vector<2x64xf32>
    %185 = arith.addf %184, %183 : vector<2x64xf32>
    %186 = arith.divf %184, %185 : vector<2x64xf32>
    %187 = vector.extract_strided_slice %186 {offsets = [0, 0], sizes = [2, 16], strides = [1, 1]} : vector<2x64xf32> to vector<2x16xf32>
    %188 = vector.extract_strided_slice %186 {offsets = [0, 16], sizes = [2, 16], strides = [1, 1]} : vector<2x64xf32> to vector<2x16xf32>
    %189 = vector.extract_strided_slice %186 {offsets = [0, 32], sizes = [2, 16], strides = [1, 1]} : vector<2x64xf32> to vector<2x16xf32>
    %190 = vector.extract_strided_slice %186 {offsets = [0, 48], sizes = [2, 16], strides = [1, 1]} : vector<2x64xf32> to vector<2x16xf32>
    %191 = vector.broadcast %175 : vector<2x1xf32> to vector<2x16xf32>
    %192 = arith.mulf %191, %180 : vector<2x16xf32>
    %193 = arith.addf %171, %192 : vector<2x16xf32>
    %194 = arith.mulf %188, %193 : vector<2x16xf32>
    %195 = arith.mulf %187, %190 : vector<2x16xf32>
    %196 = arith.addf %194, %195 : vector<2x16xf32>
    %197 = math.tanh %196 : vector<2x16xf32>
    %198 = arith.mulf %189, %197 : vector<2x16xf32>
    %199 = vector.extract_strided_slice %198 {offsets = [0, 0], sizes = [1, 16], strides = [1, 1]} : vector<2x16xf32> to vector<1x16xf32>
    %200 = vector.extract_strided_slice %198 {offsets = [1, 0], sizes = [1, 16], strides = [1, 1]} : vector<2x16xf32> to vector<1x16xf32>
    %201 = tpu.concatenate %199, %200 in 1 : vector<1x16xf32>, vector<1x16xf32> -> vector<1x32xf32>
    %202 = vector.extract_strided_slice %123 {offsets = [2, 0], sizes = [2, 80], strides = [1, 1]} : vector<16x80xf32> to vector<2x80xf32>
    %203 = vector.extract_strided_slice %169 {offsets = [0, 1], sizes = [1, 1], strides = [1, 1]} : vector<1x8xf32> to vector<1x1xf32>
    %204 = vector.extract_strided_slice %169 {offsets = [0, 7], sizes = [1, 1], strides = [1, 1]} : vector<1x8xf32> to vector<1x1xf32>
    %205 = tpu.concatenate %203, %204 in 0 : vector<1x1xf32>, vector<1x1xf32> -> vector<2x1xf32>
    %206 = tpu.concatenate %198, %196 in 1 : vector<2x16xf32>, vector<2x16xf32> -> vector<2x32xf32>
    %cst_80 = arith.constant dense<0.000000e+00> : vector<2x80xf32>
    %207 = tpu.matmul %206, %1, %cst_80 {dimension_numbers = #tpu.dot_dimension_numbers<[1], [0], [0], [1], [0, 0, 1, 1], [], []>} : vector<2x32xf32>, vector<32x80xf32>, vector<2x80xf32> -> vector<2x80xf32>
    %208 = arith.addf %202, %207 : vector<2x80xf32>
    %209 = vector.extract_strided_slice %208 {offsets = [0, 64], sizes = [2, 16], strides = [1, 1]} : vector<2x80xf32> to vector<2x16xf32>
    %210 = math.tanh %209 : vector<2x16xf32>
    %211 = vector.extract_strided_slice %208 {offsets = [0, 0], sizes = [2, 64], strides = [1, 1]} : vector<2x80xf32> to vector<2x64xf32>
    %212 = arith.negf %211 : vector<2x64xf32>
    %213 = math.exp %212 : vector<2x64xf32>
    %cst_81 = arith.constant 1.000000e+00 : f32
    %214 = vector.broadcast %cst_81 : f32 to vector<2x64xf32>
    %215 = arith.addf %214, %213 : vector<2x64xf32>
    %216 = arith.divf %214, %215 : vector<2x64xf32>
    %217 = vector.extract_strided_slice %216 {offsets = [0, 0], sizes = [2, 16], strides = [1, 1]} : vector<2x64xf32> to vector<2x16xf32>
    %218 = vector.extract_strided_slice %216 {offsets = [0, 16], sizes = [2, 16], strides = [1, 1]} : vector<2x64xf32> to vector<2x16xf32>
    %219 = vector.extract_strided_slice %216 {offsets = [0, 32], sizes = [2, 16], strides = [1, 1]} : vector<2x64xf32> to vector<2x16xf32>
    %220 = vector.extract_strided_slice %216 {offsets = [0, 48], sizes = [2, 16], strides = [1, 1]} : vector<2x64xf32> to vector<2x16xf32>
    %221 = vector.broadcast %205 : vector<2x1xf32> to vector<2x16xf32>
    %222 = arith.mulf %221, %210 : vector<2x16xf32>
    %223 = arith.addf %196, %222 : vector<2x16xf32>
    %224 = arith.mulf %218, %223 : vector<2x16xf32>
    %225 = arith.mulf %217, %220 : vector<2x16xf32>
    %226 = arith.addf %224, %225 : vector<2x16xf32>
    %227 = math.tanh %226 : vector<2x16xf32>
    %228 = arith.mulf %219, %227 : vector<2x16xf32>
    %229 = vector.extract_strided_slice %228 {offsets = [0, 0], sizes = [1, 16], strides = [1, 1]} : vector<2x16xf32> to vector<1x16xf32>
    %230 = vector.extract_strided_slice %228 {offsets = [1, 0], sizes = [1, 16], strides = [1, 1]} : vector<2x16xf32> to vector<1x16xf32>
    %231 = tpu.concatenate %229, %230 in 1 : vector<1x16xf32>, vector<1x16xf32> -> vector<1x32xf32>
    %232 = vector.extract_strided_slice %123 {offsets = [4, 0], sizes = [2, 80], strides = [1, 1]} : vector<16x80xf32> to vector<2x80xf32>
    %233 = vector.extract_strided_slice %169 {offsets = [0, 2], sizes = [1, 1], strides = [1, 1]} : vector<1x8xf32> to vector<1x1xf32>
    %234 = vector.extract_strided_slice %169 {offsets = [0, 6], sizes = [1, 1], strides = [1, 1]} : vector<1x8xf32> to vector<1x1xf32>
    %235 = tpu.concatenate %233, %234 in 0 : vector<1x1xf32>, vector<1x1xf32> -> vector<2x1xf32>
    %236 = tpu.concatenate %228, %226 in 1 : vector<2x16xf32>, vector<2x16xf32> -> vector<2x32xf32>
    %cst_82 = arith.constant dense<0.000000e+00> : vector<2x80xf32>
    %237 = tpu.matmul %236, %1, %cst_82 {dimension_numbers = #tpu.dot_dimension_numbers<[1], [0], [0], [1], [0, 0, 1, 1], [], []>} : vector<2x32xf32>, vector<32x80xf32>, vector<2x80xf32> -> vector<2x80xf32>
    %238 = arith.addf %232, %237 : vector<2x80xf32>
    %239 = vector.extract_strided_slice %238 {offsets = [0, 64], sizes = [2, 16], strides = [1, 1]} : vector<2x80xf32> to vector<2x16xf32>
    %240 = math.tanh %239 : vector<2x16xf32>
    %241 = vector.extract_strided_slice %238 {offsets = [0, 0], sizes = [2, 64], strides = [1, 1]} : vector<2x80xf32> to vector<2x64xf32>
    %242 = arith.negf %241 : vector<2x64xf32>
    %243 = math.exp %242 : vector<2x64xf32>
    %cst_83 = arith.constant 1.000000e+00 : f32
    %244 = vector.broadcast %cst_83 : f32 to vector<2x64xf32>
    %245 = arith.addf %244, %243 : vector<2x64xf32>
    %246 = arith.divf %244, %245 : vector<2x64xf32>
    %247 = vector.extract_strided_slice %246 {offsets = [0, 0], sizes = [2, 16], strides = [1, 1]} : vector<2x64xf32> to vector<2x16xf32>
    %248 = vector.extract_strided_slice %246 {offsets = [0, 16], sizes = [2, 16], strides = [1, 1]} : vector<2x64xf32> to vector<2x16xf32>
    %249 = vector.extract_strided_slice %246 {offsets = [0, 32], sizes = [2, 16], strides = [1, 1]} : vector<2x64xf32> to vector<2x16xf32>
    %250 = vector.extract_strided_slice %246 {offsets = [0, 48], sizes = [2, 16], strides = [1, 1]} : vector<2x64xf32> to vector<2x16xf32>
    %251 = vector.broadcast %235 : vector<2x1xf32> to vector<2x16xf32>
    %252 = arith.mulf %251, %240 : vector<2x16xf32>
    %253 = arith.addf %226, %252 : vector<2x16xf32>
    %254 = arith.mulf %248, %253 : vector<2x16xf32>
    %255 = arith.mulf %247, %250 : vector<2x16xf32>
    %256 = arith.addf %254, %255 : vector<2x16xf32>
    %257 = math.tanh %256 : vector<2x16xf32>
    %258 = arith.mulf %249, %257 : vector<2x16xf32>
    %259 = vector.extract_strided_slice %258 {offsets = [0, 0], sizes = [1, 16], strides = [1, 1]} : vector<2x16xf32> to vector<1x16xf32>
    %260 = vector.extract_strided_slice %258 {offsets = [1, 0], sizes = [1, 16], strides = [1, 1]} : vector<2x16xf32> to vector<1x16xf32>
    %261 = tpu.concatenate %259, %260 in 1 : vector<1x16xf32>, vector<1x16xf32> -> vector<1x32xf32>
    %262 = vector.extract_strided_slice %123 {offsets = [6, 0], sizes = [2, 80], strides = [1, 1]} : vector<16x80xf32> to vector<2x80xf32>
    %263 = vector.extract_strided_slice %169 {offsets = [0, 3], sizes = [1, 1], strides = [1, 1]} : vector<1x8xf32> to vector<1x1xf32>
    %264 = vector.extract_strided_slice %169 {offsets = [0, 5], sizes = [1, 1], strides = [1, 1]} : vector<1x8xf32> to vector<1x1xf32>
    %265 = tpu.concatenate %263, %264 in 0 : vector<1x1xf32>, vector<1x1xf32> -> vector<2x1xf32>
    %266 = tpu.concatenate %258, %256 in 1 : vector<2x16xf32>, vector<2x16xf32> -> vector<2x32xf32>
    %cst_84 = arith.constant dense<0.000000e+00> : vector<2x80xf32>
    %267 = tpu.matmul %266, %1, %cst_84 {dimension_numbers = #tpu.dot_dimension_numbers<[1], [0], [0], [1], [0, 0, 1, 1], [], []>} : vector<2x32xf32>, vector<32x80xf32>, vector<2x80xf32> -> vector<2x80xf32>
    %268 = arith.addf %262, %267 : vector<2x80xf32>
    %269 = vector.extract_strided_slice %268 {offsets = [0, 64], sizes = [2, 16], strides = [1, 1]} : vector<2x80xf32> to vector<2x16xf32>
    %270 = math.tanh %269 : vector<2x16xf32>
    %271 = vector.extract_strided_slice %268 {offsets = [0, 0], sizes = [2, 64], strides = [1, 1]} : vector<2x80xf32> to vector<2x64xf32>
    %272 = arith.negf %271 : vector<2x64xf32>
    %273 = math.exp %272 : vector<2x64xf32>
    %cst_85 = arith.constant 1.000000e+00 : f32
    %274 = vector.broadcast %cst_85 : f32 to vector<2x64xf32>
    %275 = arith.addf %274, %273 : vector<2x64xf32>
    %276 = arith.divf %274, %275 : vector<2x64xf32>
    %277 = vector.extract_strided_slice %276 {offsets = [0, 0], sizes = [2, 16], strides = [1, 1]} : vector<2x64xf32> to vector<2x16xf32>
    %278 = vector.extract_strided_slice %276 {offsets = [0, 16], sizes = [2, 16], strides = [1, 1]} : vector<2x64xf32> to vector<2x16xf32>
    %279 = vector.extract_strided_slice %276 {offsets = [0, 32], sizes = [2, 16], strides = [1, 1]} : vector<2x64xf32> to vector<2x16xf32>
    %280 = vector.extract_strided_slice %276 {offsets = [0, 48], sizes = [2, 16], strides = [1, 1]} : vector<2x64xf32> to vector<2x16xf32>
    %281 = vector.broadcast %265 : vector<2x1xf32> to vector<2x16xf32>
    %282 = arith.mulf %281, %270 : vector<2x16xf32>
    %283 = arith.addf %256, %282 : vector<2x16xf32>
    %284 = arith.mulf %278, %283 : vector<2x16xf32>
    %285 = arith.mulf %277, %280 : vector<2x16xf32>
    %286 = arith.addf %284, %285 : vector<2x16xf32>
    %287 = math.tanh %286 : vector<2x16xf32>
    %288 = arith.mulf %279, %287 : vector<2x16xf32>
    %289 = vector.extract_strided_slice %288 {offsets = [0, 0], sizes = [1, 16], strides = [1, 1]} : vector<2x16xf32> to vector<1x16xf32>
    %290 = vector.extract_strided_slice %288 {offsets = [1, 0], sizes = [1, 16], strides = [1, 1]} : vector<2x16xf32> to vector<1x16xf32>
    %291 = tpu.concatenate %289, %290 in 1 : vector<1x16xf32>, vector<1x16xf32> -> vector<1x32xf32>
    %292 = vector.extract_strided_slice %123 {offsets = [8, 0], sizes = [2, 80], strides = [1, 1]} : vector<16x80xf32> to vector<2x80xf32>
    %293 = vector.extract_strided_slice %169 {offsets = [0, 4], sizes = [1, 1], strides = [1, 1]} : vector<1x8xf32> to vector<1x1xf32>
    %294 = vector.extract_strided_slice %169 {offsets = [0, 4], sizes = [1, 1], strides = [1, 1]} : vector<1x8xf32> to vector<1x1xf32>
    %295 = tpu.concatenate %293, %294 in 0 : vector<1x1xf32>, vector<1x1xf32> -> vector<2x1xf32>
    %296 = tpu.concatenate %288, %286 in 1 : vector<2x16xf32>, vector<2x16xf32> -> vector<2x32xf32>
    %cst_86 = arith.constant dense<0.000000e+00> : vector<2x80xf32>
    %297 = tpu.matmul %296, %1, %cst_86 {dimension_numbers = #tpu.dot_dimension_numbers<[1], [0], [0], [1], [0, 0, 1, 1], [], []>} : vector<2x32xf32>, vector<32x80xf32>, vector<2x80xf32> -> vector<2x80xf32>
    %298 = arith.addf %292, %297 : vector<2x80xf32>
    %299 = vector.extract_strided_slice %298 {offsets = [0, 64], sizes = [2, 16], strides = [1, 1]} : vector<2x80xf32> to vector<2x16xf32>
    %300 = math.tanh %299 : vector<2x16xf32>
    %301 = vector.extract_strided_slice %298 {offsets = [0, 0], sizes = [2, 64], strides = [1, 1]} : vector<2x80xf32> to vector<2x64xf32>
    %302 = arith.negf %301 : vector<2x64xf32>
    %303 = math.exp %302 : vector<2x64xf32>
    %cst_87 = arith.constant 1.000000e+00 : f32
    %304 = vector.broadcast %cst_87 : f32 to vector<2x64xf32>
    %305 = arith.addf %304, %303 : vector<2x64xf32>
    %306 = arith.divf %304, %305 : vector<2x64xf32>
    %307 = vector.extract_strided_slice %306 {offsets = [0, 0], sizes = [2, 16], strides = [1, 1]} : vector<2x64xf32> to vector<2x16xf32>
    %308 = vector.extract_strided_slice %306 {offsets = [0, 16], sizes = [2, 16], strides = [1, 1]} : vector<2x64xf32> to vector<2x16xf32>
    %309 = vector.extract_strided_slice %306 {offsets = [0, 32], sizes = [2, 16], strides = [1, 1]} : vector<2x64xf32> to vector<2x16xf32>
    %310 = vector.extract_strided_slice %306 {offsets = [0, 48], sizes = [2, 16], strides = [1, 1]} : vector<2x64xf32> to vector<2x16xf32>
    %311 = vector.broadcast %295 : vector<2x1xf32> to vector<2x16xf32>
    %312 = arith.mulf %311, %300 : vector<2x16xf32>
    %313 = arith.addf %286, %312 : vector<2x16xf32>
    %314 = arith.mulf %308, %313 : vector<2x16xf32>
    %315 = arith.mulf %307, %310 : vector<2x16xf32>
    %316 = arith.addf %314, %315 : vector<2x16xf32>
    %317 = math.tanh %316 : vector<2x16xf32>
    %318 = arith.mulf %309, %317 : vector<2x16xf32>
    %319 = vector.extract_strided_slice %318 {offsets = [0, 0], sizes = [1, 16], strides = [1, 1]} : vector<2x16xf32> to vector<1x16xf32>
    %320 = vector.extract_strided_slice %318 {offsets = [1, 0], sizes = [1, 16], strides = [1, 1]} : vector<2x16xf32> to vector<1x16xf32>
    %321 = tpu.concatenate %319, %320 in 1 : vector<1x16xf32>, vector<1x16xf32> -> vector<1x32xf32>
    %322 = vector.extract_strided_slice %123 {offsets = [10, 0], sizes = [2, 80], strides = [1, 1]} : vector<16x80xf32> to vector<2x80xf32>
    %323 = vector.extract_strided_slice %169 {offsets = [0, 5], sizes = [1, 1], strides = [1, 1]} : vector<1x8xf32> to vector<1x1xf32>
    %324 = vector.extract_strided_slice %169 {offsets = [0, 3], sizes = [1, 1], strides = [1, 1]} : vector<1x8xf32> to vector<1x1xf32>
    %325 = tpu.concatenate %323, %324 in 0 : vector<1x1xf32>, vector<1x1xf32> -> vector<2x1xf32>
    %326 = tpu.concatenate %318, %316 in 1 : vector<2x16xf32>, vector<2x16xf32> -> vector<2x32xf32>
    %cst_88 = arith.constant dense<0.000000e+00> : vector<2x80xf32>
    %327 = tpu.matmul %326, %1, %cst_88 {dimension_numbers = #tpu.dot_dimension_numbers<[1], [0], [0], [1], [0, 0, 1, 1], [], []>} : vector<2x32xf32>, vector<32x80xf32>, vector<2x80xf32> -> vector<2x80xf32>
    %328 = arith.addf %322, %327 : vector<2x80xf32>
    %329 = vector.extract_strided_slice %328 {offsets = [0, 64], sizes = [2, 16], strides = [1, 1]} : vector<2x80xf32> to vector<2x16xf32>
    %330 = math.tanh %329 : vector<2x16xf32>
    %331 = vector.extract_strided_slice %328 {offsets = [0, 0], sizes = [2, 64], strides = [1, 1]} : vector<2x80xf32> to vector<2x64xf32>
    %332 = arith.negf %331 : vector<2x64xf32>
    %333 = math.exp %332 : vector<2x64xf32>
    %cst_89 = arith.constant 1.000000e+00 : f32
    %334 = vector.broadcast %cst_89 : f32 to vector<2x64xf32>
    %335 = arith.addf %334, %333 : vector<2x64xf32>
    %336 = arith.divf %334, %335 : vector<2x64xf32>
    %337 = vector.extract_strided_slice %336 {offsets = [0, 0], sizes = [2, 16], strides = [1, 1]} : vector<2x64xf32> to vector<2x16xf32>
    %338 = vector.extract_strided_slice %336 {offsets = [0, 16], sizes = [2, 16], strides = [1, 1]} : vector<2x64xf32> to vector<2x16xf32>
    %339 = vector.extract_strided_slice %336 {offsets = [0, 32], sizes = [2, 16], strides = [1, 1]} : vector<2x64xf32> to vector<2x16xf32>
    %340 = vector.extract_strided_slice %336 {offsets = [0, 48], sizes = [2, 16], strides = [1, 1]} : vector<2x64xf32> to vector<2x16xf32>
    %341 = vector.broadcast %325 : vector<2x1xf32> to vector<2x16xf32>
    %342 = arith.mulf %341, %330 : vector<2x16xf32>
    %343 = arith.addf %316, %342 : vector<2x16xf32>
    %344 = arith.mulf %338, %343 : vector<2x16xf32>
    %345 = arith.mulf %337, %340 : vector<2x16xf32>
    %346 = arith.addf %344, %345 : vector<2x16xf32>
    %347 = math.tanh %346 : vector<2x16xf32>
    %348 = arith.mulf %339, %347 : vector<2x16xf32>
    %349 = vector.extract_strided_slice %348 {offsets = [0, 0], sizes = [1, 16], strides = [1, 1]} : vector<2x16xf32> to vector<1x16xf32>
    %350 = vector.extract_strided_slice %348 {offsets = [1, 0], sizes = [1, 16], strides = [1, 1]} : vector<2x16xf32> to vector<1x16xf32>
    %351 = tpu.concatenate %349, %350 in 1 : vector<1x16xf32>, vector<1x16xf32> -> vector<1x32xf32>
    %352 = vector.extract_strided_slice %123 {offsets = [12, 0], sizes = [2, 80], strides = [1, 1]} : vector<16x80xf32> to vector<2x80xf32>
    %353 = vector.extract_strided_slice %169 {offsets = [0, 6], sizes = [1, 1], strides = [1, 1]} : vector<1x8xf32> to vector<1x1xf32>
    %354 = vector.extract_strided_slice %169 {offsets = [0, 2], sizes = [1, 1], strides = [1, 1]} : vector<1x8xf32> to vector<1x1xf32>
    %355 = tpu.concatenate %353, %354 in 0 : vector<1x1xf32>, vector<1x1xf32> -> vector<2x1xf32>
    %356 = tpu.concatenate %348, %346 in 1 : vector<2x16xf32>, vector<2x16xf32> -> vector<2x32xf32>
    %cst_90 = arith.constant dense<0.000000e+00> : vector<2x80xf32>
    %357 = tpu.matmul %356, %1, %cst_90 {dimension_numbers = #tpu.dot_dimension_numbers<[1], [0], [0], [1], [0, 0, 1, 1], [], []>} : vector<2x32xf32>, vector<32x80xf32>, vector<2x80xf32> -> vector<2x80xf32>
    %358 = arith.addf %352, %357 : vector<2x80xf32>
    %359 = vector.extract_strided_slice %358 {offsets = [0, 64], sizes = [2, 16], strides = [1, 1]} : vector<2x80xf32> to vector<2x16xf32>
    %360 = math.tanh %359 : vector<2x16xf32>
    %361 = vector.extract_strided_slice %358 {offsets = [0, 0], sizes = [2, 64], strides = [1, 1]} : vector<2x80xf32> to vector<2x64xf32>
    %362 = arith.negf %361 : vector<2x64xf32>
    %363 = math.exp %362 : vector<2x64xf32>
    %cst_91 = arith.constant 1.000000e+00 : f32
    %364 = vector.broadcast %cst_91 : f32 to vector<2x64xf32>
    %365 = arith.addf %364, %363 : vector<2x64xf32>
    %366 = arith.divf %364, %365 : vector<2x64xf32>
    %367 = vector.extract_strided_slice %366 {offsets = [0, 0], sizes = [2, 16], strides = [1, 1]} : vector<2x64xf32> to vector<2x16xf32>
    %368 = vector.extract_strided_slice %366 {offsets = [0, 16], sizes = [2, 16], strides = [1, 1]} : vector<2x64xf32> to vector<2x16xf32>
    %369 = vector.extract_strided_slice %366 {offsets = [0, 32], sizes = [2, 16], strides = [1, 1]} : vector<2x64xf32> to vector<2x16xf32>
    %370 = vector.extract_strided_slice %366 {offsets = [0, 48], sizes = [2, 16], strides = [1, 1]} : vector<2x64xf32> to vector<2x16xf32>
    %371 = vector.broadcast %355 : vector<2x1xf32> to vector<2x16xf32>
    %372 = arith.mulf %371, %360 : vector<2x16xf32>
    %373 = arith.addf %346, %372 : vector<2x16xf32>
    %374 = arith.mulf %368, %373 : vector<2x16xf32>
    %375 = arith.mulf %367, %370 : vector<2x16xf32>
    %376 = arith.addf %374, %375 : vector<2x16xf32>
    %377 = math.tanh %376 : vector<2x16xf32>
    %378 = arith.mulf %369, %377 : vector<2x16xf32>
    %379 = vector.extract_strided_slice %378 {offsets = [0, 0], sizes = [1, 16], strides = [1, 1]} : vector<2x16xf32> to vector<1x16xf32>
    %380 = vector.extract_strided_slice %378 {offsets = [1, 0], sizes = [1, 16], strides = [1, 1]} : vector<2x16xf32> to vector<1x16xf32>
    %381 = tpu.concatenate %379, %380 in 1 : vector<1x16xf32>, vector<1x16xf32> -> vector<1x32xf32>
    %382 = vector.extract_strided_slice %123 {offsets = [14, 0], sizes = [2, 80], strides = [1, 1]} : vector<16x80xf32> to vector<2x80xf32>
    %383 = vector.extract_strided_slice %169 {offsets = [0, 7], sizes = [1, 1], strides = [1, 1]} : vector<1x8xf32> to vector<1x1xf32>
    %384 = vector.extract_strided_slice %169 {offsets = [0, 1], sizes = [1, 1], strides = [1, 1]} : vector<1x8xf32> to vector<1x1xf32>
    %385 = tpu.concatenate %383, %384 in 0 : vector<1x1xf32>, vector<1x1xf32> -> vector<2x1xf32>
    %386 = tpu.concatenate %378, %376 in 1 : vector<2x16xf32>, vector<2x16xf32> -> vector<2x32xf32>
    %cst_92 = arith.constant dense<0.000000e+00> : vector<2x80xf32>
    %387 = tpu.matmul %386, %1, %cst_92 {dimension_numbers = #tpu.dot_dimension_numbers<[1], [0], [0], [1], [0, 0, 1, 1], [], []>} : vector<2x32xf32>, vector<32x80xf32>, vector<2x80xf32> -> vector<2x80xf32>
    %388 = arith.addf %382, %387 : vector<2x80xf32>
    %389 = vector.extract_strided_slice %388 {offsets = [0, 64], sizes = [2, 16], strides = [1, 1]} : vector<2x80xf32> to vector<2x16xf32>
    %390 = math.tanh %389 : vector<2x16xf32>
    %391 = vector.extract_strided_slice %388 {offsets = [0, 0], sizes = [2, 64], strides = [1, 1]} : vector<2x80xf32> to vector<2x64xf32>
    %392 = arith.negf %391 : vector<2x64xf32>
    %393 = math.exp %392 : vector<2x64xf32>
    %cst_93 = arith.constant 1.000000e+00 : f32
    %394 = vector.broadcast %cst_93 : f32 to vector<2x64xf32>
    %395 = arith.addf %394, %393 : vector<2x64xf32>
    %396 = arith.divf %394, %395 : vector<2x64xf32>
    %397 = vector.extract_strided_slice %396 {offsets = [0, 0], sizes = [2, 16], strides = [1, 1]} : vector<2x64xf32> to vector<2x16xf32>
    %398 = vector.extract_strided_slice %396 {offsets = [0, 16], sizes = [2, 16], strides = [1, 1]} : vector<2x64xf32> to vector<2x16xf32>
    %399 = vector.extract_strided_slice %396 {offsets = [0, 32], sizes = [2, 16], strides = [1, 1]} : vector<2x64xf32> to vector<2x16xf32>
    %400 = vector.extract_strided_slice %396 {offsets = [0, 48], sizes = [2, 16], strides = [1, 1]} : vector<2x64xf32> to vector<2x16xf32>
    %401 = vector.broadcast %385 : vector<2x1xf32> to vector<2x16xf32>
    %402 = arith.mulf %401, %390 : vector<2x16xf32>
    %403 = arith.addf %376, %402 : vector<2x16xf32>
    %404 = arith.mulf %398, %403 : vector<2x16xf32>
    %405 = arith.mulf %397, %400 : vector<2x16xf32>
    %406 = arith.addf %404, %405 : vector<2x16xf32>
    %407 = math.tanh %406 : vector<2x16xf32>
    %408 = arith.mulf %399, %407 : vector<2x16xf32>
    %409 = vector.extract_strided_slice %408 {offsets = [0, 0], sizes = [1, 16], strides = [1, 1]} : vector<2x16xf32> to vector<1x16xf32>
    %410 = vector.extract_strided_slice %408 {offsets = [1, 0], sizes = [1, 16], strides = [1, 1]} : vector<2x16xf32> to vector<1x16xf32>
    %411 = tpu.concatenate %409, %410 in 1 : vector<1x16xf32>, vector<1x16xf32> -> vector<1x32xf32>
    %412 = tpu.concatenate %201, %231, %261, %291, %321, %351, %381, %411 in 0 : vector<1x32xf32>, vector<1x32xf32>, vector<1x32xf32>, vector<1x32xf32>, vector<1x32xf32>, vector<1x32xf32>, vector<1x32xf32>, vector<1x32xf32> -> vector<8x32xf32>
    %c0_94 = arith.constant 0 : index
    %c0_95 = arith.constant 0 : index
    %413 = vector.load %arg6[%c0_94, %c0_95] : memref<8x32xf32, #tpu.memory_space<vmem>>, vector<8x32xf32>
    tpu.vector_store %arg6[%c0_94, %c0_95], %412 {strides = array<i32>} : memref<8x32xf32, #tpu.memory_space<vmem>>, vector<8x32xf32>,
    %414 = arith.mulf %408, %7 : vector<2x16xf32>
    %415 = vector.shape_cast %414 : vector<2x16xf32> to vector<1x2x16xf32>
    %cst_96 = arith.constant dense<0.000000e+00> : vector<1xf32>
    %416 = vector.multi_reduction <add>, %415, %cst_96 [1, 2] : vector<1x2x16xf32> to vector<1xf32>
    %417 = vector.shape_cast %416 : vector<1xf32> to vector<1x1x1xf32>
    %418 = vector.extract %417[0, 0, 0] : f32 from vector<1x1x1xf32>
    %419 = vector.broadcast %418 : f32 to vector<1x1xf32>
    %420 = arith.addf %419, %8 : vector<1x1xf32>
    %421 = arith.cmpf one, %420, %420 : vector<1x1xf32>
    %422 = math.absf %420 : vector<1x1xf32>
    %cst_97 = arith.constant 0x7F800000 : f32
    %423 = vector.broadcast %cst_97 : f32 to vector<1x1xf32>
    %424 = arith.cmpf oeq, %422, %423 : vector<1x1xf32>
    %425 = arith.ori %421, %424 : vector<1x1xi1>
    %cst_98 = arith.constant 0.000000e+00 : f32
    %426 = vector.broadcast %cst_98 : f32 to vector<1x1xf32>
    %427 = arith.select %425, %426, %420 : vector<1x1xi1>, vector<1x1xf32>
    %428 = arith.negf %427 : vector<1x1xf32>
    %429 = math.exp %428 : vector<1x1xf32>
    %cst_99 = arith.constant 1.000000e+00 : f32
    %430 = vector.broadcast %cst_99 : f32 to vector<1x1xf32>
    %431 = arith.addf %430, %429 : vector<1x1xf32>
    %432 = arith.divf %430, %431 : vector<1x1xf32>
    %c0_100 = arith.constant 0 : index
    %c0_101 = arith.constant 0 : index
    %433 = vector.load %arg7[%c0_100, %c0_101] : memref<1x1xf32, #tpu.memory_space<vmem>>, vector<1x1xf32>
    tpu.vector_store %arg7[%c0_100, %c0_101], %432 {strides = array<i32>} : memref<1x1xf32, #tpu.memory_space<vmem>>, vector<1x1xf32>,
    return
  }
}

</mosaic_0001>

<bundles_post_ra>
// kernel: ftlstm_layer_forward.1
= control target key start
LH: loop header
LB: loop body
LE: loop exit
PB: predicated region body
PF: predicated region fallthrough
CT: control target
= control target key end

     0   :  { %13 = vsyncpa [#allocation3], 0  ;;  %s2600_s0 = inlined_call_operand.hbm [shape: f32[160,128], index: 0, kind: input, shape index: {}]   ;;  %s2601_s1 = inlined_call_operand.vmem [shape: f32[1,8,32], index: 1, kind: input, shape index: {}]   ;;  %s2602_s2 = inlined_call_operand.vmem [shape: f32[1,8], index: 2, kind: input, shape index: {}]   ;;  %s2603_s3 = inlined_call_operand.vmem [shape: f32[9], index: 3, kind: input, shape index: {}]   ;;  %s2604_s4 = inlined_call_operand.vmem [shape: s32[8], index: 4, kind: input, shape index: {}]   ;;  %s2605_s5 = inlined_call_operand.vmem [shape: s32[8], index: 5, kind: input, shape index: {}]   ;;  %s2606_s6 = inlined_call_operand.hbm [shape: f32[8,32], index: 6, kind: output, shape index: {0}]   ;;  %s2607_s7 = inlined_call_operand.hbm [shape: f32[1,1], index: 7, kind: output, shape index: {1}]  }
   0x1   :  { %14 = vsyncpa [#allocation5], 0 }
   0x2   :  { %15 = vsyncpa [#allocation8], 0 }
   0x3   :  { %16 = vsyncpa [#allocation4], 0  ;;  %s50_s26 = sshll.u32 %s2604_s4, 4  ;;  %s51_s26 = int_to_ptr.vmem [resolvable:$true] %s50_s26 }
   0x4   :  { %17 = vsyncpa [#allocation12], 0  ;;  %s2088_s27 = scalar_lea.vmem %s51_s26, 16  ;;  %p2093_p1 = scmp.lt.s32.totalorder %s51_s26, %s51_s26 }
   0x5   :  { %p2089_p0 = scmp.ne.s32.totalorder %s51_s26, %s2088_s27  ;;  %p2094_p2 = scmp.lt.s32.totalorder %s2088_s27, %s2088_s27 }
   0x7   :  { %p2095_p3 = por %p2094_p2, %p2093_p1 }
   0x9   :  { %p2096_p4 = pnand %p2095_p3, %p2089_p0 }
   0xb   :  { %2099 = shalt.err (!%p2096_p4)
}
   0xc   :  { %s2200_s28 = smov [#allocation7]   ;;  %s2201_s29 = smov [#allocation2]  }
   0xd   :  { %53 = dma.vmem_to_smem %s51_s26, 16, %s2200_s28, [#allocation8]  }
   0xe   :  { %s23_s30 = sshll.u32 %s2201_s29, 4  ;;  %s2100_s10 = scalar_lea.hbm %s2600_s0, 2560  ;;  %s24_s30 = int_to_ptr.vmem [resolvable:$true] %s23_s30 }
   0xf   :  { %p2101_p5 = scmp.ne.s32.totalorder %s2600_s0, %s2100_s10  ;;  %p2104_p6 = scmp.lt.u32.totalorder %s2100_s10, %s2600_s0 }
  0x11   :  { %p2106_p7 = pnand %p2104_p6, %p2101_p5 }
  0x13   :  { %2109 = shalt.err (!%p2106_p7)
}
  0x14   :  { %s2110_s14 = scalar_lea.vmem %s24_s30, 2560  ;;  %p2115_p9 = scmp.lt.s32.totalorder %s24_s30, %s24_s30 }
  0x15   :  { %p2111_p8 = scmp.ne.s32.totalorder %s24_s30, %s2110_s14  ;;  %p2116_p10 = scmp.lt.s32.totalorder %s2110_s14, %s2110_s14 }
  0x17   :  { %p2117_p11 = por %p2116_p10, %p2115_p9 }
  0x19   :  { %p2118_p12 = pnand %p2117_p11, %p2111_p8 }
  0x1b   :  { %2121 = shalt.err (!%p2118_p12)
}
  0x1c   :  { %s2202_s15 = smov 128   ;;  %s2203_s16 = smov 8  }
  0x1d   :  { %29 = dma.hbm_to_vmem [thread:$0]  %s2600_s0, 2560, %s24_s30, [#allocation3], %s2202_s15, %s2202_s15, %s2203_s16  }
  0x1e   :  { %s40_s21 = sshll.u32 %s2603_s3, 4  ;;  %s60_s24 = sshll.u32 %s2605_s5, 4  ;;  %s41_s21 = int_to_ptr.vmem [resolvable:$true] %s40_s21  ;;  %s61_s24 = int_to_ptr.vmem [resolvable:$true] %s60_s24 }
  0x1f   :  { %s2122_s25 = scalar_lea.vmem %s41_s21, 16  ;;  %p2127_p0 = scmp.lt.s32.totalorder %s41_s21, %s41_s21 }
  0x20   :  { %p2123_p13 = scmp.ne.s32.totalorder %s41_s21, %s2122_s25  ;;  %p2128_p1 = scmp.lt.s32.totalorder %s2122_s25, %s2122_s25 }
  0x22   :  { %p2129_p2 = por %p2128_p1, %p2127_p0 }
  0x24   :  { %p2130_p3 = pnand %p2129_p2, %p2123_p13 }
  0x26   :  { %2133 = shalt.err (!%p2130_p3)
}
  0x27   :  { %s2204_s26 = smov [#allocation6]   ;;  %s2134_s0 = scalar_lea.vmem %s61_s24, 16 }
  0x28   :  { %43 = dma.vmem_to_smem %s41_s21, 16, %s2204_s26, [#allocation5]  }
  0x29   :  { %p2135_p4 = scmp.ne.s32.totalorder %s61_s24, %s2134_s0  ;;  %p2139_p5 = scmp.lt.s32.totalorder %s61_s24, %s61_s24 }
  0x2a   :  { %p2140_p6 = scmp.lt.s32.totalorder %s2134_s0, %s2134_s0 }
  0x2c   :  { %p2141_p7 = por %p2140_p6, %p2139_p5 }
  0x2e   :  { %p2142_p8 = pnand %p2141_p7, %p2135_p4 }
  0x30   :  { %2145 = shalt.err (!%p2142_p8)
}
  0x31   :  { %s2205_s3 = smov [#allocation9]  }
  0x32   :  { %63 = dma.vmem_to_smem %s61_s24, 16, %s2205_s3, [#allocation8]  }
  0x33   :  { %2190 = dma.done.wait [#allocation3], 2560  }
  0x34   :  { %2191 = vsyncadd [#allocation3], 4294964736 }
  0x35   :  { %2192 = dma.done.wait [#allocation5], 16  }
  0x36   :  { %2193 = vsyncadd [#allocation5], 4294967280 }
  0x37   :  { %2194 = dma.done.wait [#allocation8], 32  }
  0x38   :  { %2195 = vsyncadd [#allocation8], 4294967264 }
  0x39   :  { %76 = sfence }
  0x3a   :  { %v85_v0 = vld [vmem:[#allocation2 + $0x40] sm:$0xff]  ;;  %v86_v1 = vld [vmem:[#allocation2 + $0x48] sm:$0xff]  ;;  %v87_v2 = vld [vmem:[#allocation2 + $0x50] sm:$0xff]  ;;  %v2206_v3 = vmov 0.0|0.0   ;;  %vm2207_vm0 = vmmov 0   ;;  %v2208_v6 = vmov 0.0  }
  0x3b   :  { %1900 = vmatprep.subr.bf16.mxu0 %v2206_v3  ;;  %v1901_v4 = vpack.c.bf16 %v86_v1, %v85_v0  ;;  %v88_v5 = vld [vmem:[#allocation2 + $0x58] sm:$0xff]  ;;  %1798 = vmatprep.mubr.msk.f32.mxu0 %vm2207_vm0, %v2208_v6  ;;  %s204_s5 = sld [smem:[#allocation9]]  ;;  %s1697_s27 = sld [smem:[#allocation9 + $0x1]]  ;;  %v2296_v8 = vld [vmem:[#allocation2 + $0x60] ss:$0 sm:$0xff]  ;;  %vm98_vm1 = vcmask 261120  }
  0x3c   :  { %s1699_s28 = sld [smem:[#allocation9 + $0x2]]  ;;  %v1904_v7 = vpack.c.bf16 %v88_v5, %v87_v2  ;;  %s1701_s29 = sld [smem:[#allocation9 + $0x3]]  ;;  %v93_v9 = vld [vmem:[%s2601_s1] sm:$0xff]  ;;  %vm257_vm2 = vcmask 1040384   ;;  %vm259_vm3 = vcmask 1041408   ;;  %vm261_vm4 = vcmask 1042432  }
  0x3d   :  { %1902 = vmatpush3.bf16.msra.mxu0 %v1901_v4  ;;  %s1703_s30 = sld [smem:[#allocation9 + $0x4]]  ;;  %s1705_s8 = sld [smem:[#allocation9 + $0x5]]  ;;  %vm263_vm5 = vcmask 1043456   ;;  %vm265_vm6 = vcmask 1044480   ;;  %vm267_vm7 = vcmask 1045504   ;;  %vm269_vm8 = vcmask 1046528  }
  0x3e   :  { %1903 = vmatprep.subr.bf16.mxu0 %v2206_v3  ;;  %s1707_s9 = sld [smem:[#allocation9 + $0x6]]  ;;  %s1709_s10 = sld [smem:[#allocation9 + $0x7]]  ;;  %v77_v2 = vld [vmem:[#allocation2] sm:$0xff]  ;;  %v78_v4 = vld [vmem:[#allocation2 + $0x8] sm:$0xff]  ;;  %vm613_vm9 = vcmask 130048   ;;  %vm1590_vm10 = vcmask 123904  }
  0x3f   :  { %s2209_s11 = smov 96   ;;  %s1682_s20 = sld [smem:[#allocation7 + $0x1]]  ;;  %v81_v5 = vld [vmem:[#allocation2 + $0x20] sm:$0xff] }
  0x40   :  { %320 = vrot.lane.b32.xlu1 %v2296_v8, %s2209_s11  ;;  %s1684_s21 = sld [smem:[#allocation7 + $0x2]]  ;;  %s172_s22 = sld [smem:[#allocation7]] }
  0x41   :  { %1905 = vmatpush3.bf16.msra.mxu0 %v1904_v7  ;;  %s1663_s13 = scalar_lea.vmem [#allocation2], %s204_s5  ;;  %s1665_s14 = scalar_lea.vmem [#allocation2], %s1697_s27  ;;  %v1906_v7 = vpack.c.bf16 %v78_v4, %v77_v2 }
  0x42   :  { %v1696_v10 = vld [vmem:[%s1663_s13 + $0x68] sm:$0x1]  ;;  %1914 = vmatprep.subr.bf16.mxu0 %v2206_v3  ;;  %s1667_s15 = scalar_lea.vmem [#allocation2], %s1699_s28  ;;  %s1669_s16 = scalar_lea.vmem [#allocation2], %s1701_s29 }
  0x43   :  { %v1698_v11 = vld [vmem:[%s1665_s14 + $0x68] sm:$0x1]  ;;  %s1671_s17 = scalar_lea.vmem [#allocation2], %s1703_s30  ;;  %s1673_s18 = scalar_lea.vmem [#allocation2], %s1705_s8  ;;  %1907 = vmatprep.subr.bf16.mxu1 %v1906_v7 }
  0x44   :  { %v1700_v12 = vld [vmem:[%s1667_s15 + $0x68] sm:$0x1]  ;;  %1799 = vmatmul.mubr.msk.f32.vlgmr.msra.gmra.mrb[0].mxu0 %vm98_vm1, %v93_v9  ;;  %s1675_s1 = scalar_lea.vmem [#allocation2], %s1707_s9  ;;  %v273_v17 = vrot.slane %v1698_v11, 7  ;;  %s1677_s19 = scalar_lea.vmem [#allocation2], %s1709_s10  ;;  %v80_v11 = vld [vmem:[#allocation2 + $0x18] sm:$0xff]  ;;  %1909 = vmatpush3.bf16.msra.mxu1 %v1906_v7 }
  0x45   :  { %v1702_v13 = vld [vmem:[%s1669_s16 + $0x68] sm:$0x1]  ;;  %1820 = vmatprep.mubr.msk.f32.mxu0 %vm2207_vm0, %v2208_v6  ;;  %v276_v19 = vrot.slane %v1700_v12, 6  ;;  %s1686_s23 = sld [smem:[#allocation7 + $0x3]]  ;;  %s1688_s24 = sld [smem:[#allocation7 + $0x4]] }
  0x46   :  { %v1704_v14 = vld [vmem:[%s1671_s17 + $0x68] sm:$0x1]  ;;  %v279_v20 = vrot.slane %v1702_v13, 5  ;;  %v293_v23 = vsel %vm257_vm2, %v1696_v10, %v273_v17  ;;  %s1649_s25 = scalar_lea.vmem [#allocation2], %s1682_s20  ;;  %s1690_s26 = sld [smem:[#allocation7 + $0x5]]  ;;  %v79_v10 = vld [vmem:[#allocation2 + $0x10] sm:$0xff] }
  0x47   :  { %v1706_v15 = vld [vmem:[%s1673_s18 + $0x68] sm:$0x1]  ;;  %v282_v21 = vrot.slane %v1704_v14, 4  ;;  %v294_v25 = vsel %vm259_vm3, %v293_v23, %v276_v19  ;;  %s1651_s0 = scalar_lea.vmem [#allocation2], %s1684_s21  ;;  %s1647_s3 = scalar_lea.vmem [#allocation2], %s172_s22  ;;  %v1910_v13 = vpack.c.bf16 %v80_v11, %v79_v10  ;;  %v83_v14 = vld [vmem:[#allocation2 + $0x30] sm:$0xff] }
  0x48   :  { %v1708_v16 = vld [vmem:[%s1675_s1 + $0x68] sm:$0x1]  ;;  %v285_v22 = vrot.slane %v1706_v15, 3  ;;  %v295_v27 = vsel %vm261_vm4, %v294_v25, %v279_v20  ;;  %s1692_s5 = sld [smem:[#allocation7 + $0x6]]  ;;  %s1694_s28 = sld [smem:[#allocation7 + $0x7]]  ;;  %v2211_v17 = vmov 0  }
  0x49   :  { %v1710_v18 = vld [vmem:[%s1677_s19 + $0x68] sm:$0x1]  ;;  %v288_v24 = vrot.slane %v1708_v16, 2  ;;  %v296_v28 = vsel %vm263_vm5, %v295_v27, %v282_v21  ;;  %s2210_s10 = smov 64   ;;  %1911 = vmatprep.subr.bf16.mxu1 %v1910_v13  ;;  %v442_v16 = vld [vmem:[%s2602_s2] sm:$0x1]  ;;  %1995 = vset.pattern.permute.xlu1 %v2211_v17 }
  0x4a   :  { %v291_v26 = vrot.slane %v1710_v18, 1  ;;  %v297_v29 = vsel %vm265_vm6, %v296_v28, %v285_v22  ;;  %v1683_v32 = vld [vmem:[%s1649_s25 + $0x68] sm:$0x1]  ;;  %1913 = vmatpush3.bf16.msra.mxu1 %v1910_v13  ;;  %s1717_s13 = sld [smem:[#allocation6 + $0x4]]  ;;  %2004 = vlog2.f32 %v442_v16  ;;  %s1714_s14 = sld [smem:[#allocation6 + $0x1]] }
  0x4b   :  { %v298_v30 = vsel %vm267_vm7, %v297_v29, %v288_v24  ;;  %v1685_v33 = vld [vmem:[%s1651_s0 + $0x68] sm:$0x1]  ;;  %v237_v34 = vrot.slane %v1683_v32, 7  ;;  %s1653_s27 = scalar_lea.vmem [#allocation2], %s1686_s23  ;;  %s1655_s29 = scalar_lea.vmem [#allocation2], %s1688_s24  ;;  %1920 = vmatprep.subr.bf16.mxu1 %v2206_v3 }
  0x4c   :  { %v299_v31 = vsel %vm269_vm8, %v298_v30, %v291_v26  ;;  %v1681_v35 = vld [vmem:[%s1647_s3 + $0x68] sm:$0x1]  ;;  %v240_v37 = vrot.slane %v1685_v33, 6  ;;  %s1657_s30 = scalar_lea.vmem [#allocation2], %s1690_s26  ;;  %s1718_s2 = sld [smem:[#allocation6 + $0x5]] }
  0x4d   :  { %301 = vrot.lane.b32.xlu0 %v299_v31, %s2209_s11  ;;  %v1687_v36 = vld [vmem:[%s1653_s27 + $0x68] sm:$0x1]  ;;  %v258_v38 = vsel %vm257_vm2, %v1681_v35, %v237_v34  ;;  %s443_s15 = sld [smem:[#allocation6]]  ;;  %s1715_s16 = sld [smem:[#allocation6 + $0x2]] }
  0x4e   :  { %v1689_v39 = vld [vmem:[%s1655_s29 + $0x68] sm:$0x1]  ;;  %v243_v40 = vrot.slane %v1687_v36, 5  ;;  %v260_v41 = vsel %vm259_vm3, %v258_v38, %v240_v37  ;;  %s1659_s8 = scalar_lea.vmem [#allocation2], %s1692_s5  ;;  %s1661_s9 = scalar_lea.vmem [#allocation2], %s1694_s28 }
  0x4f   :  { %v1691_v42 = vld [vmem:[%s1657_s30 + $0x68] sm:$0x1]  ;;  %v246_v43 = vrot.slane %v1689_v39, 4  ;;  %s1716_s17 = sld [smem:[#allocation6 + $0x3]]  ;;  %s1719_s18 = sld [smem:[#allocation6 + $0x6]] }
  0x50   :  { %v262_v44 = vsel %vm261_vm4, %v260_v41, %v243_v40  ;;  %v1693_v45 = vld [vmem:[%s1659_s8 + $0x68] sm:$0x1]  ;;  %v249_v46 = vrot.slane %v1691_v42, 3  ;;  %v466_v18 = vstv %s1717_s13  ;;  %v454_v21 = vstv %s1714_s14  ;;  %s1720_s1 = sld [smem:[#allocation6 + $0x7]]  ;;  %s1721_s19 = sld [smem:[#allocation6 + $0x8]] }
  0x51   :  { %v264_v47 = vsel %vm263_vm5, %v262_v44, %v246_v43  ;;  %v1695_v48 = vld [vmem:[%s1661_s9 + $0x68] sm:$0x1]  ;;  %v252_v49 = vrot.slane %v1693_v45, 2  ;;  %2006 = vrcp.f32 %v466_v18  ;;  %s2212_s20 = smov 80   ;;  %s2213_s21 = smov 16  }
  0x52   :  { %v266_v50 = vsel %vm265_vm6, %v264_v47, %v249_v46  ;;  %v255_v51 = vrot.slane %v1695_v48, 1  ;;  %v82_v9 = vld [vmem:[#allocation2 + $0x28] sm:$0xff]  ;;  %v471_v27 = vstv %s1718_s2  ;;  %v490_v47 = vlaneseq  ;;  %s2215_s22 = smov 122   ;;  %s2216_s23 = smov 124  }
  0x53   :  { %v268_v52 = vsel %vm267_vm7, %v266_v50, %v252_v49  ;;  %v2331_v12 = vpack.c.bf16 %v82_v9, %v81_v5  ;;  %v458_v31 = vstv %s443_s15  ;;  %v462_v34 = vstv %s1715_s16  ;;  %s2218_s24 = smov 126   ;;  %s2221_s25 = smov 2  }
  0x54   :  { %v270_v54 = vsel %vm269_vm8, %v268_v52, %v255_v51  ;;  %v2005_v19 = vpop.eup %2004  ;;  %v463_v36 = vmul.f32 %v462_v34, %v442_v16  ;;  %v491_v51 = vshrl.u32 %v490_v47, 7  ;;  %s2223_s26 = smov 4   ;;  %s2225_s0 = smov 6  }
  0x55   :  { %1916 = vmatpush3.bf16.msra.mxu0 %v2331_v12  ;;  %v453_v20 = vmul.f32 0.6931472, %v2005_v19  ;;  %v464_v37 = vstv %s1716_s17  ;;  %v478_v41 = vstv %s1719_s18  ;;  %s2227_s3 = smov 32   ;;  %s2228_s5 = smov 112  }
  0x56   :  { %1917 = vmatprep.subr.bf16.mxu0 %v2206_v3  ;;  %v465_v39 = vsub.f32 %v464_v37, %v463_v36  ;;  %v480_v42 = vstv %s1720_s1  ;;  %v483_v45 = vstv %s1721_s19 }
  0x57   :  { %v455_v23 = vmul.f32 %v454_v21, %v453_v20 }
  0x58   :  { %v481_v44 = vmul.f32 %v480_v42, %v465_v39 }
  0x59   :  { %v456_v25 = vmul.f32 1.442695, %v455_v23 }
  0x5b   :  { %v2007_v22 = vpop.eup %2006 }
  0x5c   :  { %v468_v24 = vmul.f32 %v2007_v22, %v442_v16 }
  0x5e   :  { %2008 = vlog2.f32 %v468_v24 }
  0x5f   :  { %2010 = vpow2.f32 %v456_v25 }
  0x68   :  { %v2009_v26 = vpop.eup %2008 }
  0x69   :  { %v470_v28 = vmul.f32 0.6931472, %v2009_v26  ;;  %v2011_v30 = vpop.eup %2010 }
  0x6a   :  { %v459_v33 = vmul.f32 %v2011_v30, %v458_v31  ;;  %v1711_v30 = vld [vmem:[#allocation2 + $0x61] ss:$0 sm:$0xff] }
  0x6b   :  { %v472_v29 = vmul.f32 %v471_v27, %v470_v28 }
  0x6d   :  { %v473_v32 = vmul.f32 1.442695, %v472_v29 }
  0x6f   :  { %2012 = vpow2.f32 %v473_v32 }
  0x70   :  { %2014 = vrcp.f32 %v459_v33 }
  0x79   :  { %v2013_v35 = vpop.eup %2012 }
  0x7a   :  { %v475_v38 = vadd.f32 1.0, %v2013_v35  ;;  %v2015_v40 = vpop.eup %2014 }
  0x7b   :  { %v479_v43 = vmul.f32 %v2015_v40, %v478_v41 }
  0x7c   :  { %2016 = vrcp.f32 %v475_v38 }
  0x7d   :  { %v482_v46 = vadd.f32 %v481_v44, %v479_v43 }
  0x86   :  { %v2017_v48 = vpop.eup %2016 }
  0x87   :  { %v484_v49 = vmul.f32 %v2017_v48, %v483_v45 }
  0x89   :  { %v485_v50 = vadd.f32 %v484_v49, %v482_v46 }
  0x8b   :  { %v486_v52 = vmax.f32 %v485_v50, 0.0  ;;  %v2214_v50 = vmov 1  }
  0xbf   :  { %v302_v57 = vpop.permute.xlu0 %301 }
 0x117   :  { %v168_v53 = vpop.f32.mrb[0].mxu0 }
 0x118   :  { %v169_v55 = vadd.f32 %v2296_v8, %v168_v53  ;;  %v1800_v56 = vpop.f32.mrb[1].mxu0  ;;  %v487_v53 = vmin.f32 %v486_v52, 1.0 }
 0x11a   :  { %v271_v58 = vadd.f32 %v270_v54, %v169_v55  ;;  %v492_v54 = vsub.s32 0, %v491_v51  ;;  %v2350_v55 = vadd.f32 -1.0, %v487_v53 }
 0x11c   :  { %v304_v59 = vadd.f32 %v302_v57, %v271_v58  ;;  %v2353_v56 = vrot.slane %v2350_v55, %v492_v54  ;;  %v321_v58 = vpop.permute.xlu1 %320 }
 0x11e   :  { %v305_v60 = vsel %vm98_vm1, %v304_v59, 0.0  ;;  %v2358_v57 = vsel %vm257_vm2, %v2350_v55, %v2353_v56 }
 0x11f   :  { %306 = vadd.xlane.f32.xlu0 %v305_v60 }
 0x1ac   :  { %v307_v61 = vpop.xlane.xlu0 %306 }
 0x1ad   :  { %v309_v62 = vmul.f32 0.03125, %v307_v61 }
 0x1af   :  { %v2324_v63 = vsub.f32 %v304_v59, %v309_v62 }
 0x1b1   :  { %v311_v0 = vmul.f32 %v2324_v63, %v2324_v63 }
 0x1b3   :  { %v312_v1 = vsel %vm98_vm1, %v311_v0, 0.0 }
 0x1b4   :  { %313 = vadd.xlane.f32.xlu1 %v312_v1 }
 0x1c5   :  { %324 = vrot.lane.b32.xlu1 %v2296_v8, %s2210_s10  ;;  %v84_v8 = vld [vmem:[#allocation2 + $0x38] sm:$0xff] }
 0x1c6   :  { %v2335_v15 = vpack.c.bf16 %v84_v8, %v83_v14 }
 0x1c8   :  { %1919 = vmatpush3.bf16.msra.mxu0 %v2335_v15 }
 0x1c9   :  { %1926 = vmatprep.subr.bf16.mxu0 %v2206_v3  ;;  %579 = vperm.xlu1 %1995, %v2358_v57  }
 0x1cb   :  { %1821 = vmatmul.mubr.f32.vlgmr.msra.gmra.mrb[2].mxu0 %v2208_v6 }
 0x1cc   :  { %1928 = vmatpush3.bf16.msra.mxu0 %v2331_v12  ;;  %1842 = vmatprep.mubr.msk.f32.mxu0 %vm2207_vm0, %v2208_v6 }
 0x1cd   :  { %1929 = vmatprep.subr.bf16.mxu0 %v2206_v3  ;;  %1996 = vset.pattern.permute.xlu1 %v2214_v50 }
 0x1d0   :  { %1931 = vmatpush3.bf16.msra.mxu0 %v2335_v15 }
 0x1d1   :  { %1938 = vmatprep.subr.bf16.mxu0 %v2206_v3 }
 0x241   :  { %v314_v59 = vpop.xlane.xlu1 %313 }
 0x242   :  { %v315_v60 = vmul.f32 0.03125, %v314_v59 }
 0x244   :  { %v316_v61 = vadd.f32 1e-12, %v315_v60 }
 0x245   :  { %v325_v1 = vpop.permute.xlu1 %324 }
 0x246   :  { %2018 = vrsqrt.f32 %v316_v61 }
 0x249   :  { %v580_v41 = vpop.permute.xlu1 %579 }
 0x250   :  { %v2019_v62 = vpop.eup %2018 }
 0x251   :  { %v318_v0 = vmul.f32 %v2019_v62, %v2324_v63 }
 0x253   :  { %v323_v2 = vmul.f32 %v321_v58, %v318_v0 }
 0x255   :  { %v327_v4 = vadd.f32 %v325_v1, %v323_v2 }
 0x257   :  { %v329_v5 = vrot.slane %v327_v4, 6  ;;  %v331_v7 = vrot.slane %v327_v4, 7  ;;  %v333_v9 = vrot.slane %v327_v4, 3  ;;  %v337_v10 = vrot.slane %v327_v4, 4 }
 0x258   :  { %v339_v11 = vrot.slane %v327_v4, 2  ;;  %v335_v18 = vrot.slane %v327_v4, 5  ;;  %v341_v21 = vrot.slane %v327_v4, 1 }
 0x259   :  { %v343_v13 = vsel %vm257_vm2, %v327_v4, %v329_v5 }
 0x25a   :  { %v344_v14 = vsel %vm259_vm3, %v343_v13, %v331_v7  ;;  %v350_v8 = vsel %vm257_vm2, %v337_v10, %v339_v11 }
 0x25b   :  { %v345_v16 = vsel %vm261_vm4, %v344_v14, %v333_v9  ;;  %v351_v17 = vsel %vm259_vm3, %v350_v8, %v333_v9 }
 0x25c   :  { %v346_v63 = vsel %vm263_vm5, %v345_v16, %v329_v5  ;;  %v352_v19 = vsel %vm261_vm4, %v351_v17, %v331_v7 }
 0x25d   :  { %v347_v20 = vsel %vm265_vm6, %v346_v63, %v327_v4  ;;  %v353_v22 = vsel %vm263_vm5, %v352_v19, %v339_v11 }
 0x25e   :  { %v348_v23 = vsel %vm267_vm7, %v347_v20, %v335_v18  ;;  %v354_v24 = vsel %vm265_vm6, %v353_v22, %v337_v10 }
 0x25f   :  { %v349_v25 = vsel %vm269_vm8, %v348_v23, %v335_v18  ;;  %v355_v26 = vsel %vm267_vm7, %v354_v24, %v341_v21 }
 0x260   :  { %1809 = vmatprep.mubr.msk.f32.mxu1 %vm98_vm1, %v349_v25  ;;  %v356_v27 = vsel %vm269_vm8, %v355_v26, %v341_v21 }
 0x261   :  { %1810 = vmatmul.mubr.msk.f32.vlgmr.msra.gmra.mrb[0].mxu1 %vm98_vm1, %v356_v27 }
 0x262   :  { %1922 = vmatpush3.bf16.msra.mxu1 %v2331_v12  ;;  %1831 = vmatprep.mubr.msk.f32.mxu1 %vm2207_vm0, %v2208_v6 }
 0x263   :  { %1923 = vmatprep.subr.bf16.mxu1 %v2206_v3 }
 0x266   :  { %1925 = vmatpush3.bf16.msra.mxu1 %v2335_v15 }
 0x267   :  { %1932 = vmatprep.subr.bf16.mxu1 %v2206_v3 }
 0x29e   :  { %v565_v28 = vpop.f32.mrb[2].mxu0 }
 0x29f   :  { %v1822_v29 = vpop.f32.mrb[3].mxu0 }
 0x334   :  { %v1811_v31 = vpop.f32.mrb[0].mxu1 }
 0x335   :  { %v2384_v32 = vadd.f32 %v1811_v31, %v1711_v30  ;;  %v433_v33 = vpop.f32.mrb[1].mxu1 }
 0x336   :  { %v2386_v34 = vadd.f32 %v1711_v30, %v433_v33 }
 0x338   :  { %v569_v35 = vadd.f32 %v565_v28, %v2386_v34  ;;  %v2217_v28 = vmov 2  }
 0x339   :  { %1997 = vset.pattern.permute.xlu0 %v2217_v28 }
 0x33a   :  { %v1723_v36 = vmul.f32 -1.442695, %v569_v35 }
 0x33c   :  { %2020 = vpow2.f32 %v1723_v36 }
 0x33d   :  { %2022 = vtanh.f32 %v569_v35 }
 0x346   :  { %v2021_v37 = vpop.eup %2020 }
 0x347   :  { %v574_v38 = vadd.f32 1.0, %v2021_v37  ;;  %v2023_v39 = vpop.eup %2022 }
 0x348   :  { %v582_v42 = vmul.f32 %v2023_v39, %v580_v41 }
 0x349   :  { %2024 = vrcp.f32 %v574_v38 }
 0x353   :  { %v2025_v40 = vpop.eup %2024 }
 0x354   :  { %590 = vrot.lane.b32.xlu1 %v2025_v40, %s2212_s20 }
 0x358   :  { %585 = vrot.lane.b32.xlu1 %v582_v42, %s2212_s20 }
 0x3c6   :  { %v591_v43 = vpop.permute.xlu1 %590 }
 0x3c7   :  { %v593_v44 = vmul.f32 %v2025_v40, %v591_v43 }
 0x3c9   :  { %595 = vrot.lane.b32.xlu0 %v593_v44, %s2213_s21 }
 0x3ca   :  { %v586_v45 = vpop.permute.xlu1 %585 }
 0x3cb   :  { %v588_v46 = vmul.f32 %v2025_v40, %v586_v45 }
 0x43b   :  { %v596_v47 = vpop.permute.xlu0 %595 }
 0x43c   :  { %v598_v48 = vadd.f32 %v596_v47, %v588_v46 }
 0x43e   :  { %2026 = vtanh.f32 %v598_v48 }
 0x448   :  { %v2027_v49 = vpop.eup %2026 }
 0x449   :  { %601 = vrot.lane.b32.xlu1 %v2027_v49, %s2213_s21 }
 0x4bb   :  { %v602_v51 = vpop.permute.xlu1 %601 }
 0x4bc   :  { %v2393_v52 = vmul.f32 %v2025_v40, %v602_v51 }
 0x4be   :  { %606 = vrot.lane.b32.xlu1 %v2393_v52, %s2209_s11 }
 0x4c2   :  { %615 = vrot.lane.b32.xlu1 %v2353_v56, %s2215_s22 }
 0x530   :  { %v2398_v53 = vpop.permute.xlu1 %606 }
 0x531   :  { %v619_v54 = vsel %vm613_vm9, %v2398_v53, %v598_v48 }
 0x532   :  { %1832 = vmatmul.mubr.msk.f32.vlgmr.msra.gmra.mrb[2].mxu1 %vm98_vm1, %v619_v54 }
 0x533   :  { %1934 = vmatpush3.bf16.msra.mxu1 %v2331_v12  ;;  %1853 = vmatprep.mubr.msk.f32.mxu1 %vm2207_vm0, %v2208_v6 }
 0x534   :  { %1935 = vmatprep.subr.bf16.mxu1 %v2206_v3  ;;  %v616_v58 = vpop.permute.xlu1 %615 }
 0x535   :  { %v618_v59 = vsel %vm257_vm2, %v2350_v55, %v616_v58 }
 0x536   :  { %706 = vperm.xlu1 %1996, %v618_v59  }
 0x537   :  { %1937 = vmatpush3.bf16.msra.mxu1 %v2335_v15 }
 0x538   :  { %1944 = vmatprep.subr.bf16.mxu1 %v2206_v3 }
 0x5b5   :  { %v707_v10 = vpop.permute.xlu1 %706 }
 0x605   :  { %v689_v60 = vpop.f32.mrb[2].mxu1 }
 0x606   :  { %v694_v61 = vrot.slane %v689_v60, 6  ;;  %v1833_v62 = vpop.f32.mrb[3].mxu1 }
 0x608   :  { %v696_v0 = vadd.f32 %v694_v61, %v2386_v34 }
 0x60a   :  { %2028 = vtanh.f32 %v696_v0  ;;  %v1725_v1 = vmul.f32 -1.442695, %v696_v0 }
 0x60c   :  { %2030 = vpow2.f32 %v1725_v1 }
 0x614   :  { %v2029_v2 = vpop.eup %2028 }
 0x615   :  { %v710_v4 = vrot.slane %v2029_v2, 2 }
 0x616   :  { %v2031_v5 = vpop.eup %2030 }
 0x617   :  { %v701_v7 = vadd.f32 1.0, %v2031_v5  ;;  %711 = vrot.lane.b32.xlu1 %v710_v4, %s2210_s10  ;;  %v2219_v4 = vmov 3  }
 0x618   :  { %1998 = vset.pattern.permute.xlu1 %v2219_v4 }
 0x619   :  { %2032 = vrcp.f32 %v701_v7 }
 0x623   :  { %v2033_v9 = vpop.eup %2032 }
 0x624   :  { %725 = vrot.lane.b32.xlu0 %v2033_v9, %s2212_s20 }
 0x689   :  { %v712_v11 = vpop.permute.xlu1 %711 }
 0x68a   :  { %v714_v13 = vmul.f32 %v712_v11, %v707_v10 }
 0x68c   :  { %716 = vrot.lane.b32.xlu1 %v714_v13, %s2213_s21 }
 0x696   :  { %v726_v14 = vpop.permute.xlu0 %725 }
 0x697   :  { %v728_v8 = vmul.f32 %v2033_v9, %v726_v14 }
 0x699   :  { %730 = vrot.lane.b32.xlu0 %v728_v8, %s2213_s21 }
 0x6fe   :  { %v717_v16 = vpop.permute.xlu1 %716 }
 0x6ff   :  { %v719_v17 = vadd.f32 %v717_v16, %v598_v48 }
 0x701   :  { %v721_v18 = vrot.slane %v719_v17, 6 }
 0x703   :  { %v723_v63 = vmul.f32 %v2033_v9, %v721_v18 }
 0x70b   :  { %v731_v19 = vpop.permute.xlu0 %730 }
 0x70c   :  { %v733_v20 = vadd.f32 %v731_v19, %v723_v63 }
 0x70e   :  { %2034 = vtanh.f32 %v733_v20 }
 0x718   :  { %v2035_v21 = vpop.eup %2034 }
 0x719   :  { %736 = vrot.lane.b32.xlu1 %v2035_v21, %s2213_s21 }
 0x71d   :  { %749 = vrot.lane.b32.xlu1 %v2353_v56, %s2216_s23 }
 0x78b   :  { %v737_v22 = vpop.permute.xlu1 %736 }
 0x78c   :  { %v2418_v23 = vmul.f32 %v2033_v9, %v737_v22 }
 0x78e   :  { %741 = vrot.lane.b32.xlu0 %v2418_v23, %s2209_s11 }
 0x78f   :  { %v750_v27 = vpop.permute.xlu1 %749 }
 0x790   :  { %v752_v29 = vsel %vm257_vm2, %v2350_v55, %v750_v27 }
 0x792   :  { %841 = vperm.xlu0 %1997, %v752_v29  }
 0x800   :  { %v2422_v24 = vpop.permute.xlu0 %741 }
 0x801   :  { %v753_v25 = vsel %vm613_vm9, %v2422_v24, %v733_v20 }
 0x802   :  { %v755_v26 = vrot.slane %v753_v25, 2 }
 0x804   :  { %1843 = vmatmul.mubr.msk.f32.vlgmr.msra.gmra.mrb[4].mxu0 %vm98_vm1, %v755_v26 }
 0x805   :  { %1940 = vmatpush3.bf16.msra.mxu0 %v2331_v12  ;;  %1864 = vmatprep.mubr.msk.f32.mxu0 %vm2207_vm0, %v2208_v6 }
 0x806   :  { %1941 = vmatprep.subr.bf16.mxu0 %v2206_v3 }
 0x809   :  { %1943 = vmatpush3.bf16.msra.mxu0 %v2335_v15 }
 0x80a   :  { %1950 = vmatprep.subr.bf16.mxu0 %v2206_v3 }
 0x811   :  { %v842_v42 = vpop.permute.xlu0 %841 }
 0x8d7   :  { %v824_v30 = vpop.f32.mrb[4].mxu0 }
 0x8d8   :  { %v829_v31 = vrot.slane %v824_v30, 4  ;;  %v1844_v33 = vpop.f32.mrb[5].mxu0 }
 0x8d9   :  { %v2220_v33 = vmov 4  }
 0x8da   :  { %v831_v35 = vadd.f32 %v829_v31, %v2386_v34  ;;  %1999 = vset.pattern.permute.xlu0 %v2220_v33 }
 0x8dc   :  { %2036 = vtanh.f32 %v831_v35  ;;  %v1727_v36 = vmul.f32 -1.442695, %v831_v35 }
 0x8de   :  { %2038 = vpow2.f32 %v1727_v36 }
 0x8e6   :  { %v2037_v37 = vpop.eup %2036 }
 0x8e7   :  { %v845_v38 = vrot.slane %v2037_v37, 4 }
 0x8e8   :  { %v2039_v39 = vpop.eup %2038 }
 0x8e9   :  { %v836_v40 = vadd.f32 1.0, %v2039_v39  ;;  %846 = vrot.lane.b32.xlu1 %v845_v38, %s2210_s10 }
 0x8eb   :  { %2040 = vrcp.f32 %v836_v40 }
 0x8f5   :  { %v2041_v41 = vpop.eup %2040 }
 0x8f6   :  { %861 = vrot.lane.b32.xlu1 %v2041_v41, %s2212_s20 }
 0x95b   :  { %v847_v43 = vpop.permute.xlu1 %846 }
 0x95c   :  { %v849_v44 = vmul.f32 %v847_v43, %v842_v42 }
 0x95e   :  { %v851_v45 = vrot.slane %v849_v44, 6 }
 0x960   :  { %852 = vrot.lane.b32.xlu0 %v851_v45, %s2213_s21 }
 0x968   :  { %v862_v46 = vpop.permute.xlu1 %861 }
 0x969   :  { %v864_v47 = vmul.f32 %v2041_v41, %v862_v46 }
 0x96b   :  { %866 = vrot.lane.b32.xlu1 %v864_v47, %s2213_s21 }
 0x9d2   :  { %v853_v48 = vpop.permute.xlu0 %852 }
 0x9d3   :  { %v855_v49 = vadd.f32 %v853_v48, %v733_v20 }
 0x9d5   :  { %v857_v50 = vrot.slane %v855_v49, 6 }
 0x9d7   :  { %v859_v51 = vmul.f32 %v2041_v41, %v857_v50 }
 0x9dd   :  { %v867_v54 = vpop.permute.xlu1 %866 }
 0x9de   :  { %v869_v58 = vadd.f32 %v867_v54, %v859_v51 }
 0x9e0   :  { %2042 = vtanh.f32 %v869_v58 }
 0x9ea   :  { %v2043_v59 = vpop.eup %2042 }
 0x9eb   :  { %872 = vrot.lane.b32.xlu0 %v2043_v59, %s2213_s21 }
 0x9ef   :  { %885 = vrot.lane.b32.xlu0 %v2353_v56, %s2218_s24 }
 0xa5d   :  { %v873_v60 = vpop.permute.xlu0 %872 }
 0xa5e   :  { %v2442_v61 = vmul.f32 %v2041_v41, %v873_v60 }
 0xa60   :  { %877 = vrot.lane.b32.xlu1 %v2442_v61, %s2209_s11 }
 0xa61   :  { %v886_v2 = vpop.permute.xlu0 %885 }
 0xa62   :  { %v888_v5 = vsel %vm257_vm2, %v2350_v55, %v886_v2 }
 0xa64   :  { %977 = vperm.xlu1 %1998, %v888_v5  }
 0xad2   :  { %v2446_v62 = vpop.permute.xlu1 %877 }
 0xad3   :  { %v889_v0 = vsel %vm613_vm9, %v2446_v62, %v869_v58 }
 0xad4   :  { %v891_v1 = vrot.slane %v889_v0, 4 }
 0xad6   :  { %1854 = vmatmul.mubr.msk.f32.vlgmr.msra.gmra.mrb[4].mxu1 %vm98_vm1, %v891_v1 }
 0xad7   :  { %1946 = vmatpush3.bf16.msra.mxu1 %v2331_v12  ;;  %1875 = vmatprep.mubr.msk.f32.mxu1 %vm2207_vm0, %v2208_v6 }
 0xad8   :  { %1947 = vmatprep.subr.bf16.mxu1 %v2206_v3 }
 0xadb   :  { %1949 = vmatpush3.bf16.msra.mxu1 %v2335_v15 }
 0xadc   :  { %1956 = vmatprep.subr.bf16.mxu1 %v2206_v3 }
 0xae3   :  { %v978_v63 = vpop.permute.xlu1 %977 }
 0xba9   :  { %v960_v7 = vpop.f32.mrb[4].mxu1 }
 0xbaa   :  { %v965_v9 = vrot.slane %v960_v7, 2  ;;  %v1855_v10 = vpop.f32.mrb[5].mxu1 }
 0xbac   :  { %v967_v11 = vadd.f32 %v965_v9, %v2386_v34 }
 0xbae   :  { %2044 = vtanh.f32 %v967_v11  ;;  %v1729_v13 = vmul.f32 -1.442695, %v967_v11  ;;  %v2222_v11 = vmov 5  }
 0xbb0   :  { %2046 = vpow2.f32 %v1729_v13 }
 0xbb8   :  { %v2045_v14 = vpop.eup %2044 }
 0xbb9   :  { %v981_v8 = vrot.slane %v2045_v14, 6 }
 0xbba   :  { %v2047_v16 = vpop.eup %2046 }
 0xbbb   :  { %v972_v17 = vadd.f32 1.0, %v2047_v16  ;;  %982 = vrot.lane.b32.xlu0 %v981_v8, %s2210_s10 }
 0xbbd   :  { %2048 = vrcp.f32 %v972_v17 }
 0xbc7   :  { %v2049_v18 = vpop.eup %2048 }
 0xbc8   :  { %997 = vrot.lane.b32.xlu1 %v2049_v18, %s2212_s20 }
 0xc2d   :  { %v983_v19 = vpop.permute.xlu0 %982 }
 0xc2e   :  { %v985_v20 = vmul.f32 %v983_v19, %v978_v63 }
 0xc30   :  { %v987_v21 = vrot.slane %v985_v20, 4 }
 0xc32   :  { %988 = vrot.lane.b32.xlu0 %v987_v21, %s2213_s21 }
 0xc3a   :  { %v998_v34 = vpop.permute.xlu1 %997 }
 0xc3b   :  { %v1000_v22 = vmul.f32 %v2049_v18, %v998_v34 }
 0xc3d   :  { %1002 = vrot.lane.b32.xlu1 %v1000_v22, %s2213_s21 }
 0xca4   :  { %v989_v25 = vpop.permute.xlu0 %988 }
 0xca5   :  { %v991_v26 = vadd.f32 %v989_v25, %v869_v58 }
 0xca7   :  { %v993_v27 = vrot.slane %v991_v26, 6 }
 0xca9   :  { %v995_v28 = vmul.f32 %v2049_v18, %v993_v27 }
 0xcaf   :  { %v1003_v29 = vpop.permute.xlu1 %1002 }
 0xcb0   :  { %v1005_v30 = vadd.f32 %v1003_v29, %v995_v28 }
 0xcb2   :  { %2050 = vtanh.f32 %v1005_v30 }
 0xcbc   :  { %v2051_v31 = vpop.eup %2050 }
 0xcbd   :  { %1008 = vrot.lane.b32.xlu0 %v2051_v31, %s2213_s21 }
 0xcc1   :  { %1105 = vperm.xlu0 %1999, %v2358_v57  }
 0xcc5   :  { %2000 = vset.pattern.permute.xlu0 %v2222_v11 }
 0xd2f   :  { %v1009_v35 = vpop.permute.xlu0 %1008 }
 0xd30   :  { %v2466_v36 = vmul.f32 %v2049_v18, %v1009_v35 }
 0xd32   :  { %1013 = vrot.lane.b32.xlu1 %v2466_v36, %s2209_s11 }
 0xd40   :  { %v1106_v46 = vpop.permute.xlu0 %1105 }
 0xda4   :  { %v2470_v37 = vpop.permute.xlu1 %1013 }
 0xda5   :  { %v1021_v38 = vsel %vm613_vm9, %v2470_v37, %v1005_v30 }
 0xda6   :  { %v1023_v39 = vrot.slane %v1021_v38, 6 }
 0xda8   :  { %1865 = vmatmul.mubr.msk.f32.vlgmr.msra.gmra.mrb[6].mxu0 %vm98_vm1, %v1023_v39 }
 0xda9   :  { %1952 = vmatpush3.bf16.msra.mxu0 %v2331_v12  ;;  %1886 = vmatprep.mubr.msk.f32.mxu0 %vm2207_vm0, %v2208_v6 }
 0xdaa   :  { %1953 = vmatprep.subr.bf16.mxu0 %v2206_v3 }
 0xdad   :  { %1955 = vmatpush3.bf16.msra.mxu0 %v2335_v15 }
 0xe7b   :  { %v1092_v57 = vpop.f32.mrb[6].mxu0 }
 0xe7c   :  { %v1096_v40 = vadd.f32 %v1092_v57, %v2384_v32  ;;  %v1866_v41 = vpop.f32.mrb[7].mxu0 }
 0xe7d   :  { %v2224_v41 = vmov 6  }
 0xe7e   :  { %v1731_v42 = vmul.f32 -1.442695, %v1096_v40  ;;  %2001 = vset.pattern.permute.xlu1 %v2224_v41 }
 0xe80   :  { %2052 = vpow2.f32 %v1731_v42 }
 0xe81   :  { %2054 = vtanh.f32 %v1096_v40 }
 0xe8a   :  { %v2053_v43 = vpop.eup %2052 }
 0xe8b   :  { %v1101_v44 = vadd.f32 1.0, %v2053_v43  ;;  %v2055_v45 = vpop.eup %2054 }
 0xe8c   :  { %v1108_v47 = vmul.f32 %v2055_v45, %v1106_v46 }
 0xe8d   :  { %2056 = vrcp.f32 %v1101_v44 }
 0xe8e   :  { %v1110_v49 = vrot.slane %v1108_v47, 2 }
 0xe97   :  { %v2057_v48 = vpop.eup %2056 }
 0xe98   :  { %1120 = vrot.lane.b32.xlu1 %v2057_v48, %s2212_s20 }
 0xe9c   :  { %1111 = vrot.lane.b32.xlu1 %v1110_v49, %s2212_s20 }
 0xf0a   :  { %v1121_v50 = vpop.permute.xlu1 %1120 }
 0xf0b   :  { %v1123_v51 = vmul.f32 %v2057_v48, %v1121_v50 }
 0xf0d   :  { %1125 = vrot.lane.b32.xlu0 %v1123_v51, %s2213_s21 }
 0xf0e   :  { %v1112_v54 = vpop.permute.xlu1 %1111 }
 0xf0f   :  { %v1114_v58 = vadd.f32 %v1112_v54, %v1005_v30 }
 0xf11   :  { %v1116_v59 = vrot.slane %v1114_v58, 6 }
 0xf13   :  { %v1118_v60 = vmul.f32 %v2057_v48, %v1116_v59 }
 0xf7f   :  { %v1126_v0 = vpop.permute.xlu0 %1125 }
 0xf80   :  { %v1128_v1 = vadd.f32 %v1126_v0, %v1118_v60 }
 0xf82   :  { %2058 = vtanh.f32 %v1128_v1 }
 0xf8c   :  { %v2059_v2 = vpop.eup %2058 }
 0xf8d   :  { %1131 = vrot.lane.b32.xlu1 %v2059_v2, %s2213_s21 }
 0xf91   :  { %1144 = vrot.lane.b32.xlu1 %v2353_v56, %s2221_s25 }
 0xfff   :  { %v1132_v4 = vpop.permute.xlu1 %1131 }
0x1000   :  { %v2486_v5 = vmul.f32 %v2057_v48, %v1132_v4 }
0x1002   :  { %1136 = vrot.lane.b32.xlu0 %v2486_v5, %s2209_s11 }
0x1003   :  { %v1145_v10 = vpop.permute.xlu1 %1144 }
0x1004   :  { %v1147_v13 = vsel %vm257_vm2, %v2350_v55, %v1145_v10 }
0x1006   :  { %1235 = vperm.xlu0 %2000, %v1147_v13  }
0x1074   :  { %v2490_v7 = vpop.permute.xlu0 %1136 }
0x1075   :  { %v1148_v9 = vsel %vm613_vm9, %v2490_v7, %v1128_v1 }
0x1076   :  { %1876 = vmatmul.mubr.msk.f32.vlgmr.msra.gmra.mrb[6].mxu1 %vm98_vm1, %v1148_v9 }
0x1077   :  { %1958 = vmatpush3.bf16.msra.mxu1 %v2331_v12  ;;  %1897 = vmatprep.mubr.msk.f32.mxu1 %vm2207_vm0, %v2208_v6 }
0x1078   :  { %1959 = vmatprep.subr.bf16.mxu1 %v2206_v3 }
0x107b   :  { %1961 = vmatpush3.bf16.msra.mxu1 %v2335_v15 }
0x1085   :  { %v1236_v19 = vpop.permute.xlu0 %1235 }
0x1149   :  { %v1218_v14 = vpop.f32.mrb[6].mxu1 }
0x114a   :  { %v1223_v8 = vrot.slane %v1218_v14, 6  ;;  %v1877_v16 = vpop.f32.mrb[7].mxu1 }
0x114c   :  { %v1225_v17 = vadd.f32 %v1223_v8, %v2384_v32 }
0x114e   :  { %2060 = vtanh.f32 %v1225_v17  ;;  %v1733_v12 = vmul.f32 -1.442695, %v1225_v17 }
0x1150   :  { %2062 = vpow2.f32 %v1733_v12 }
0x1158   :  { %v2061_v6 = vpop.eup %2060 }
0x1159   :  { %v1239_v18 = vrot.slane %v2061_v6, 2 }
0x115a   :  { %v2063_v3 = vpop.eup %2062 }
0x115b   :  { %v1230_v63 = vadd.f32 1.0, %v2063_v3  ;;  %1240 = vrot.lane.b32.xlu1 %v1239_v18, %s2210_s10 }
0x115d   :  { %2064 = vrcp.f32 %v1230_v63  ;;  %v2226_v63 = vmov 7  }
0x115e   :  { %2003 = vset.pattern.permute.xlu0 %v2226_v63 }
0x1167   :  { %v2065_v15 = vpop.eup %2064 }
0x1168   :  { %1254 = vrot.lane.b32.xlu1 %v2065_v15, %s2212_s20 }
0x11cd   :  { %v1241_v20 = vpop.permute.xlu1 %1240 }
0x11ce   :  { %v1243_v21 = vmul.f32 %v1241_v20, %v1236_v19 }
0x11d0   :  { %1245 = vrot.lane.b32.xlu0 %v1243_v21, %s2213_s21 }
0x11da   :  { %v1255_v34 = vpop.permute.xlu1 %1254 }
0x11db   :  { %v1257_v22 = vmul.f32 %v2065_v15, %v1255_v34 }
0x11dd   :  { %1259 = vrot.lane.b32.xlu1 %v1257_v22, %s2213_s21 }
0x1242   :  { %v1246_v25 = vpop.permute.xlu0 %1245 }
0x1243   :  { %v1248_v26 = vadd.f32 %v1246_v25, %v1128_v1 }
0x1245   :  { %v1250_v27 = vrot.slane %v1248_v26, 6 }
0x1247   :  { %v1252_v28 = vmul.f32 %v2065_v15, %v1250_v27 }
0x124f   :  { %v1260_v29 = vpop.permute.xlu1 %1259 }
0x1250   :  { %v1262_v30 = vadd.f32 %v1260_v29, %v1252_v28 }
0x1252   :  { %2066 = vtanh.f32 %v1262_v30 }
0x125c   :  { %v2067_v31 = vpop.eup %2066 }
0x125d   :  { %1265 = vrot.lane.b32.xlu0 %v2067_v31, %s2213_s21 }
0x1261   :  { %1278 = vrot.lane.b32.xlu0 %v2353_v56, %s2223_s26 }
0x12cf   :  { %v1266_v33 = vpop.permute.xlu0 %1265 }
0x12d0   :  { %v2509_v35 = vmul.f32 %v2065_v15, %v1266_v33 }
0x12d2   :  { %1270 = vrot.lane.b32.xlu1 %v2509_v35, %s2209_s11 }
0x12d3   :  { %v1279_v40 = vpop.permute.xlu0 %1278 }
0x12d4   :  { %v1281_v42 = vsel %vm257_vm2, %v2350_v55, %v1279_v40 }
0x12d6   :  { %1370 = vperm.xlu1 %2001, %v1281_v42  }
0x12da   :  { %2002 = vset.pattern.permute.xlu1 %v2226_v63 }
0x1344   :  { %v2513_v38 = vpop.permute.xlu1 %1270 }
0x1345   :  { %v1282_v39 = vsel %vm613_vm9, %v2513_v38, %v1262_v30 }
0x1346   :  { %v1284_v57 = vrot.slane %v1282_v39, 2  ;;  %v91_v39 = vld [vmem:[#allocation2 + $0x62] sm:$0x3] }
0x1348   :  { %1887 = vmatmul.mubr.msk.f32.vlgmr.msra.gmra.mrb[8].mxu0 %vm98_vm1, %v1284_v57  ;;  %v1580_v57 = vrot.slane %v91_v39, 2 }
0x1355   :  { %v1371_v58 = vpop.permute.xlu1 %1370 }
0x141b   :  { %v1353_v43 = vpop.f32.mrb[8].mxu0 }
0x141c   :  { %v1358_v44 = vrot.slane %v1353_v43, 4  ;;  %v1888_v45 = vpop.f32.mrb[9].mxu0 }
0x141e   :  { %v1360_v46 = vadd.f32 %v1358_v44, %v2384_v32 }
0x1420   :  { %2068 = vtanh.f32 %v1360_v46  ;;  %v1735_v47 = vmul.f32 -1.442695, %v1360_v46 }
0x1422   :  { %2070 = vpow2.f32 %v1735_v47 }
0x142a   :  { %v2069_v48 = vpop.eup %2068 }
0x142b   :  { %v1374_v49 = vrot.slane %v2069_v48, 4 }
0x142c   :  { %v2071_v50 = vpop.eup %2070 }
0x142d   :  { %v1365_v51 = vadd.f32 1.0, %v2071_v50  ;;  %1375 = vrot.lane.b32.xlu0 %v1374_v49, %s2210_s10 }
0x142f   :  { %2072 = vrcp.f32 %v1365_v51 }
0x1439   :  { %v2073_v54 = vpop.eup %2072 }
0x143a   :  { %1390 = vrot.lane.b32.xlu1 %v2073_v54, %s2212_s20 }
0x149f   :  { %v1376_v59 = vpop.permute.xlu0 %1375 }
0x14a0   :  { %v1378_v60 = vmul.f32 %v1376_v59, %v1371_v58  ;;  %v880_v58 = vrot.slane %v2442_v61, 1  ;;  %v609_v59 = vrot.slane %v2393_v52, 1 }
0x14a2   :  { %v1380_v0 = vrot.slane %v1378_v60, 6  ;;  %v1016_v60 = vrot.slane %v2466_v36, 1 }
0x14a4   :  { %1381 = vrot.lane.b32.xlu0 %v1380_v0, %s2213_s21  ;;  %v1139_v0 = vrot.slane %v2486_v5, 1 }
0x14ac   :  { %v1391_v1 = vpop.permute.xlu1 %1390 }
0x14ad   :  { %v1393_v2 = vmul.f32 %v2073_v54, %v1391_v1  ;;  %v1273_v1 = vrot.slane %v2509_v35, 1 }
0x14af   :  { %1395 = vrot.lane.b32.xlu1 %v1393_v2, %s2213_s21 }
0x1516   :  { %v1382_v4 = vpop.permute.xlu0 %1381 }
0x1517   :  { %v1384_v9 = vadd.f32 %v1382_v4, %v1262_v30 }
0x1519   :  { %v1386_v10 = vrot.slane %v1384_v9, 6 }
0x151b   :  { %v1388_v11 = vmul.f32 %v2073_v54, %v1386_v10 }
0x1521   :  { %v1396_v13 = vpop.permute.xlu1 %1395 }
0x1522   :  { %v1398_v14 = vadd.f32 %v1396_v13, %v1388_v11 }
0x1524   :  { %2074 = vtanh.f32 %v1398_v14 }
0x152e   :  { %v2075_v8 = vpop.eup %2074 }
0x152f   :  { %1401 = vrot.lane.b32.xlu0 %v2075_v8, %s2213_s21 }
0x1533   :  { %1414 = vrot.lane.b32.xlu0 %v2353_v56, %s2225_s0 }
0x15a1   :  { %v1402_v16 = vpop.permute.xlu0 %1401 }
0x15a2   :  { %v2527_v17 = vmul.f32 %v2073_v54, %v1402_v16  ;;  %v744_v54 = vrot.slane %v2418_v23, 1 }
0x15a4   :  { %1406 = vrot.lane.b32.xlu1 %v2527_v17, %s2209_s11  ;;  %v1409_v2 = vrot.slane %v2527_v17, 1 }
0x15a5   :  { %v1415_v3 = vpop.permute.xlu0 %1414 }
0x15a6   :  { %v1417_v56 = vsel %vm257_vm2, %v2350_v55, %v1415_v3 }
0x15a8   :  { %1506 = vperm.xlu1 %2002, %v1417_v56  }
0x1616   :  { %v2531_v12 = vpop.permute.xlu1 %1406 }
0x1617   :  { %v1418_v6 = vsel %vm613_vm9, %v2531_v12, %v1398_v14 }
0x1618   :  { %v1420_v18 = vrot.slane %v1418_v6, 4 }
0x161a   :  { %1898 = vmatmul.mubr.msk.f32.vlgmr.msra.gmra.mrb[8].mxu1 %vm98_vm1, %v1420_v18 }
0x1627   :  { %v1507_v55 = vpop.permute.xlu1 %1506 }
0x16ed   :  { %v1489_v15 = vpop.f32.mrb[8].mxu1 }
0x16ee   :  { %v1494_v19 = vrot.slane %v1489_v15, 2  ;;  %v1899_v20 = vpop.f32.mrb[9].mxu1 }
0x16f0   :  { %v1496_v21 = vadd.f32 %v1494_v19, %v2384_v32 }
0x16f2   :  { %2076 = vtanh.f32 %v1496_v21  ;;  %v1737_v34 = vmul.f32 -1.442695, %v1496_v21 }
0x16f4   :  { %2078 = vpow2.f32 %v1737_v34 }
0x16fc   :  { %v2077_v22 = vpop.eup %2076 }
0x16fd   :  { %v1510_v25 = vrot.slane %v2077_v22, 6 }
0x16fe   :  { %v2079_v26 = vpop.eup %2078 }
0x16ff   :  { %v1501_v27 = vadd.f32 1.0, %v2079_v26  ;;  %1511 = vrot.lane.b32.xlu0 %v1510_v25, %s2210_s10 }
0x1701   :  { %2080 = vrcp.f32 %v1501_v27 }
0x170b   :  { %v2081_v28 = vpop.eup %2080 }
0x170c   :  { %1526 = vrot.lane.b32.xlu1 %v2081_v28, %s2212_s20 }
0x1771   :  { %v1512_v29 = vpop.permute.xlu0 %1511 }
0x1772   :  { %v1514_v30 = vmul.f32 %v1512_v29, %v1507_v55 }
0x1774   :  { %v1516_v31 = vrot.slane %v1514_v30, 4 }
0x1776   :  { %1517 = vrot.lane.b32.xlu0 %v1516_v31, %s2213_s21 }
0x177e   :  { %v1527_v32 = vpop.permute.xlu1 %1526 }
0x177f   :  { %v1529_v33 = vmul.f32 %v2081_v28, %v1527_v32 }
0x1781   :  { %1531 = vrot.lane.b32.xlu1 %v1529_v33, %s2213_s21 }
0x1785   :  { %1581 = vrot.lane.b32.xlu1 %v1580_v57, %s2227_s3 }
0x17e8   :  { %v1518_v40 = vpop.permute.xlu0 %1517 }
0x17e9   :  { %v1520_v41 = vadd.f32 %v1518_v40, %v1398_v14 }
0x17eb   :  { %v1522_v42 = vrot.slane %v1520_v41, 6 }
0x17ed   :  { %v1524_v43 = vmul.f32 %v2081_v28, %v1522_v42 }
0x17f3   :  { %v1532_v44 = vpop.permute.xlu1 %1531 }
0x17f4   :  { %v1534_v45 = vadd.f32 %v1532_v44, %v1524_v43 }
0x17f6   :  { %2082 = vtanh.f32 %v1534_v45 }
0x17f7   :  { %v1582_v48 = vpop.permute.xlu1 %1581 }
0x1800   :  { %v2083_v46 = vpop.eup %2082 }
0x1801   :  { %1537 = vrot.lane.b32.xlu0 %v2083_v46, %s2213_s21 }
0x1873   :  { %v1538_v47 = vpop.permute.xlu0 %1537 }
0x1874   :  { %v1540_v49 = vmul.f32 %v2081_v28, %v1538_v47 }
0x1876   :  { %v1584_v50 = vmul.f32 %v1582_v48, %v1540_v49  ;;  %v1545_v23 = vrot.slane %v1540_v49, 1 }
0x1878   :  { %v1586_v51 = vrot.slane %v1584_v50, 6 }
0x187a   :  { %1587 = vrot.lane.b32.xlu0 %v1586_v51, %s2209_s11 }
0x187e   :  { %745 = vrot.lane.b32.xlu0 %v744_v54, %s2228_s5 }
0x1882   :  { %881 = vrot.lane.b32.xlu0 %v880_v58, %s2228_s5 }
0x1886   :  { %610 = vrot.lane.b32.xlu0 %v609_v59, %s2228_s5 }
0x188a   :  { %1017 = vrot.lane.b32.xlu0 %v1016_v60, %s2228_s5 }
0x188e   :  { %1140 = vrot.lane.b32.xlu0 %v1139_v0, %s2228_s5 }
0x1892   :  { %1274 = vrot.lane.b32.xlu0 %v1273_v1, %s2228_s5 }
0x1896   :  { %1410 = vrot.lane.b32.xlu0 %v1409_v2, %s2228_s5 }
0x189a   :  { %1542 = vrot.lane.b32.xlu0 %v1540_v49, %s2209_s11  ;;  %s2229_s11 = smov [#allocation10]  }
0x189b   :  { %s1622_s27 = sshll.u32 %s2229_s11, 4  ;;  %s1623_s27 = int_to_ptr.vmem [resolvable:$true] %s1622_s27 }
0x189c   :  { %s2146_s28 = scalar_lea.vmem %s1623_s27, 128  ;;  %p2151_p10 = scmp.lt.s32.totalorder %s1623_s27, %s1623_s27 }
0x189d   :  { %p2147_p9 = scmp.ne.s32.totalorder %s1623_s27, %s2146_s28  ;;  %p2152_p11 = scmp.lt.s32.totalorder %s2146_s28, %s2146_s28 }
0x189e   :  { %1546 = vrot.lane.b32.xlu0 %v1545_v23, %s2228_s5 }
0x189f   :  { %p2153_p12 = por %p2152_p11, %p2151_p10 }
0x18a1   :  { %p2154_p13 = pnand %p2153_p12, %p2147_p9 }
0x18ec   :  { %v1588_v61 = vpop.permute.xlu0 %1587 }
0x18ed   :  { %v1591_v52 = vsel %vm1590_vm10, %v1588_v61, 0.0 }
0x18ee   :  { %1592 = vadd.xlane.f32.xlu1 %v1591_v52 }
0x18f0   :  { %v746_v4 = vpop.permute.xlu0 %745 }
0x18f1   :  { %v748_v35 = vsel %vm613_vm9, %v2422_v24, %v746_v4 }
0x18f2   :  { %v1551_v16 = vrot.slane %v748_v35, 1 }
0x18f4   :  { %v882_v36 = vpop.permute.xlu0 %881 }
0x18f5   :  { %v884_v17 = vsel %vm613_vm9, %v2446_v62, %v882_v36 }
0x18f6   :  { %v1554_v56 = vrot.slane %v884_v17, 2 }
0x18f8   :  { %v611_v9 = vpop.permute.xlu0 %610 }
0x18f9   :  { %v614_v14 = vsel %vm613_vm9, %v2398_v53, %v611_v9 }
0x18fa   :  { %v1571_v3 = vsel %vm257_vm2, %v614_v14, %v1551_v16 }
0x18fb   :  { %v1572_v19 = vsel %vm259_vm3, %v1571_v3, %v1554_v56 }
0x18fc   :  { %v1018_v10 = vpop.permute.xlu0 %1017 }
0x18fd   :  { %v1020_v8 = vsel %vm613_vm9, %v2470_v37, %v1018_v10 }
0x18fe   :  { %v1557_v24 = vrot.slane %v1020_v8, 3 }
0x1900   :  { %v1141_v5 = vpop.permute.xlu0 %1140  ;;  %v1573_v62 = vsel %vm261_vm4, %v1572_v19, %v1557_v24 }
0x1901   :  { %v1143_v6 = vsel %vm613_vm9, %v2490_v7, %v1141_v5 }
0x1902   :  { %v1560_v15 = vrot.slane %v1143_v6, 4 }
0x1904   :  { %v1275_v11 = vpop.permute.xlu0 %1274  ;;  %v1574_v7 = vsel %vm263_vm5, %v1573_v62, %v1560_v15 }
0x1905   :  { %v1277_v18 = vsel %vm613_vm9, %v2513_v38, %v1275_v11 }
0x1906   :  { %v1563_v37 = vrot.slane %v1277_v18, 5 }
0x1908   :  { %v1411_v13 = vpop.permute.xlu0 %1410  ;;  %v1575_v22 = vsel %vm265_vm6, %v1574_v7, %v1563_v37 }
0x1909   :  { %v1413_v63 = vsel %vm613_vm9, %v2531_v12, %v1411_v13 }
0x190a   :  { %v1566_v20 = vrot.slane %v1413_v63, 6 }
0x190c   :  { %v1543_v53 = vpop.permute.xlu0 %1542  ;;  %v1576_v25 = vsel %vm267_vm7, %v1575_v22, %v1566_v20 }
0x1910   :  { %v1547_v21 = vpop.permute.xlu0 %1546 }
0x1911   :  { %v1549_v38 = vsel %vm613_vm9, %v1543_v53, %v1547_v21 }
0x1912   :  { %v1569_v34 = vrot.slane %v1549_v38, 7 }
0x1914   :  { %v1577_v12 = vsel %vm269_vm8, %v1576_v25, %v1569_v34 }
0x1915   :  { %1578 = vst.msk [vmem:[#allocation10] sm:$0xff] %vm98_vm1, %v1577_v12 }
0x1916   :  { %2157 = shalt.err (!%p2154_p13)
}
0x1917   :  { %s2158_s8 = scalar_lea.hbm %s2606_s6, 128 }
0x1918   :  { %p2159_p0 = scmp.ne.s32.totalorder %s2606_s6, %s2158_s8  ;;  %p2162_p1 = scmp.lt.u32.totalorder %s2158_s8, %s2606_s6 }
0x191a   :  { %p2164_p2 = pnand %p2162_p1, %p2159_p0 }
0x191c   :  { %2167 = shalt.err (!%p2164_p2)
}
0x191d   :  { %1625 = dma.vmem_to_hbm [thread:$0]  %s1623_s27, 128, %s2606_s6, [#allocation4]   ;;  %v92_v32 = vld [vmem:[#allocation2 + $0x64] sm:$0x1]  ;;  %vm1614_vm14 = vcmask 0  }
0x191e   :  { %s2230_s6 = smov [#allocation11]  }
0x191f   :  { %s1632_s15 = sshll.u32 %s2230_s6, 4  ;;  %s1633_s15 = int_to_ptr.vmem [resolvable:$true] %s1632_s15 }
0x1920   :  { %s2168_s16 = scalar_lea.vmem %s1633_s15, 16  ;;  %s2172_s17 = scalar_lea.vmem %s1633_s15, 32 }
0x1921   :  { %p2169_p3 = scmp.ne.s32.totalorder %s1633_s15, %s2168_s16  ;;  %p2173_p4 = scmp.lt.s32.totalorder %s1633_s15, %s1633_s15 }
0x1922   :  { %p2174_p5 = scmp.lt.s32.totalorder %s2172_s17, %s2168_s16 }
0x1924   :  { %p2175_p6 = por %p2174_p5, %p2173_p4 }
0x1926   :  { %p2176_p7 = pnand %p2175_p6, %p2169_p3 }
0x197b   :  { %v1593_v26 = vpop.xlane.xlu1 %1592 }
0x197c   :  { %v1594_v27 = vrot.slane %v1593_v26, 4 }
0x197e   :  { %v1595_v28 = vadd.f32 %v1594_v27, %v1593_v26 }
0x1980   :  { %v1596_v55 = vrot.slane %v1595_v28, 2 }
0x1982   :  { %v1597_v29 = vadd.f32 %v1596_v55, %v1595_v28 }
0x1984   :  { %v1598_v30 = vrot.slane %v1597_v29, 1 }
0x1986   :  { %v1599_v31 = vadd.f32 %v1598_v30, %v1597_v29 }
0x1988   :  { %1962 = vpush %v1599_v31 }
0x19b9   :  { %s1963_s2 = spop %1962 }
0x19ba   :  { %v1601_v33 = vstv %s1963_s2 }
0x19bb   :  { %v1602_v39 = vadd.f32 %v1601_v33, %v92_v32 }
0x19bd   :  { %v1604_v57 = vand.u32 2147483647, %v1602_v39  ;;  %vm1603_vm11 = vcmp.ne.f32.partialorder %v1602_v39, %v1602_v39 }
0x19bf   :  { %vm1605_vm12 = vcmp.eq.f32.partialorder %v1604_v57, inf }
0x19c0   :  { %vm1606_vm13 = vmor %vm1603_vm11, %vm1605_vm12 }
0x19c1   :  { %v1607_v40 = vsel %vm1606_vm13, 0.0, %v1602_v39 }
0x19c2   :  { %v1738_v41 = vmul.f32 -1.442695, %v1607_v40 }
0x19c4   :  { %2084 = vpow2.f32 %v1738_v41 }
0x19ce   :  { %v2085_v42 = vpop.eup %2084 }
0x19cf   :  { %v1611_v43 = vadd.f32 1.0, %v2085_v42 }
0x19d1   :  { %2086 = vrcp.f32 %v1611_v43 }
0x19db   :  { %v2087_v44 = vpop.eup %2086 }
0x19dc   :  { %1615 = vst.msk [vmem:[#allocation11] sm:$0x1] %vm1614_vm14, %v2087_v44 }
0x19dd   :  { %2179 = shalt.err (!%p2176_p7)
}
0x19de   :  { %s2180_s19 = scalar_lea.hbm %s2607_s7, 16 }
0x19df   :  { %p2181_p8 = scmp.ne.s32.totalorder %s2607_s7, %s2180_s19  ;;  %p2184_p9 = scmp.lt.u32.totalorder %s2180_s19, %s2607_s7 }
0x19e1   :  { %p2186_p10 = pnand %p2184_p9, %p2181_p8 }
0x19e3   :  { %2189 = shalt.err (!%p2186_p10)
}
0x19e4   :  { %1635 = dma.vmem_to_hbm [thread:$0]  %s1633_s15, 16, %s2607_s7, [#allocation12]  }
0x19e5   :  { %2196 = dma.done.wait [#allocation4], 128  }
0x19e6   :  { %2197 = vsyncadd [#allocation4], 4294967168 }
0x19e7   :  { %2198 = dma.done.wait [#allocation12], 16  }
0x19e8   :  { %2199 = vsyncadd [#allocation12], 4294967280 }
0x19e9   :  { %1642 = vsyncpa [#allocation3], 1 }
0x19ea   :  { %1643 = vsyncpa [#allocation4], 1 }
0x19eb   :  { %1644 = vsyncpa [#allocation12], 1 }
0x19ec   :  { %1645 = vsyncpa [#allocation5], 1 }
0x19ed   :  { %1646 = vsyncpa [#allocation8], 1 }

</bundles_post_ra>
